<compile_context>
chip_gen: v6e
topology: v6e:2x2x1
jax: 0.10.0
libtpu: 0.0.40
codegen_flags: <defaults>
</compile_context>

<pallas_src>
import jax
import jax.numpy as jnp
from jax.experimental import pallas as pl
from jax.experimental.pallas import tpu as pltpu


def _make_flow_kernel(S, GC, GH):
    """S = C//d value sub-groups per coords row, GC = G*C = 128, GH = G*H."""

    def kernel(coords_ref, vals_ref, w1b_ref, b1b_ref, w2b_ref, b2b_ref, out_ref):
        # coords_ref: (rows, 128) f32   lane = (point offset in row)*d + coord
        # vals_ref:   (rows, S*128)     lane = (point offset in row)*C + channel
        # w1b_ref: (128, GH) bf16 = kron(I_G, W1);  w2b_ref: (S*GH, 128) bf16 = kron(I_P, W2)
        # Start from coords + b2 so the second bias is folded into one add.
        acc = coords_ref[...].astype(jnp.float32) + b2b_ref[...]
        for a in range(S):  # static unroll over the S value sub-groups
            v = vals_ref[:, a * GC:(a + 1) * GC].astype(jnp.bfloat16)       # (rows, 128)
            h = jnp.dot(v, w1b_ref[...], preferred_element_type=jnp.float32)  # (rows, GH)
            h = jnp.maximum(h + b1b_ref[...], 0.0).astype(jnp.bfloat16)
            acc = acc + jnp.dot(h, w2b_ref[a * GH:(a + 1) * GH, :],
                                preferred_element_type=jnp.float32)          # (rows, 128)
        out_ref[...] = acc.astype(out_ref.dtype)

    return kernel


def flow_layer(coords, values, w1, b1, w2, b2, *, tm=16384):
    """coords: (B, N, d) f32, values: (B, N, C).  Returns coords + MLP(values)."""
    B, N, d = coords.shape
    C = values.shape[-1]
    H = w1.shape[-1]
    M = B * N

    # Lane-packing geometry (specialised fast path; holds for this module's
    # C=8, H=32, d=2 stand-in MLP).
    assert 128 % C == 0 and 128 % d == 0 and C % d == 0, (C, d)
    P = 128 // d            # points per 128-lane coords/output row
    G = 128 // C            # points per 128-lane values sub-group
    S = C // d              # values sub-groups per coords row (== P // G)
    GC, GH = G * C, G * H   # 128, packed hidden width
    row_q = 8 * P           # points per (8,128) tile -> tm quantum

    # ---- tile size (points): large (amortise ~0.35us/step, long DMAs), multiple
    # of row_q, never larger than the (padded) problem, clamped so the grid keeps
    # >= 4 (>= 2) steps: the "parallel" axis then shards across both v7x TCs.
    tm = max(row_q, (int(tm) // row_q) * row_q)
    tm = min(tm, pl.cdiv(M, row_q) * row_q)
    for min_steps in (4, 2):
        cap = (M // (min_steps * row_q)) * row_q
        if cap >= row_q:
            tm = min(tm, cap)
            break
    grid = pl.cdiv(M, tm)
    m_pad = grid * tm

    coords_flat = coords.reshape(M, d)
    values_flat = values.reshape(M, C)
    if m_pad != M:
        # Rare fallback (costs one extra HBM pass); keep B*N a multiple of
        # 8*128//d to stay on the zero-copy path.
        coords_flat = jnp.pad(coords_flat, ((0, m_pad - M), (0, 0)))
        values_flat = jnp.pad(values_flat, ((0, m_pad - M), (0, 0)))

    # Zero-copy regroupings (same row-major order): lanes fully dense, M on sublanes.
    rows_total = m_pad // P
    coords_g = coords_flat.reshape(rows_total, P * d)     # (R, 128)
    values_g = values_flat.reshape(rows_total, P * C)     # (R, S*128)

    # Block-diagonal packed weights (tiny, folded under jit), bf16 for the MXU.
    f32 = jnp.float32
    w1b = jnp.kron(jnp.eye(G, dtype=f32), w1.astype(f32)).astype(jnp.bfloat16)  # (128, GH)
    w2b = jnp.kron(jnp.eye(P, dtype=f32), w2.astype(f32)).astype(jnp.bfloat16)  # (S*GH, 128)
    b1b = jnp.tile(b1.astype(f32), G).reshape(1, GH)
    b2b = jnp.tile(b2.astype(f32), P).reshape(1, P * d)

    rows = tm // P  # block sublane extent (multiple of 8 by construction)

    # True HBM traffic of this call as launched (inputs streamed once, weights resident).
    bytes_accessed = int(values_g.size * values_g.dtype.itemsize
                         + 2 * coords_g.size * coords_g.dtype.itemsize
                         + w1b.size * 2 + w2b.size * 2 + b1b.size * 4 + b2b.size * 4)
    flops = int(2 * rows_total * S * GH * (GC + P * d))   # executed MXU flops

    kernel = _make_flow_kernel(S, GC, GH)

    out_g = pl.pallas_call(
        kernel,
        out_shape=jax.ShapeDtypeStruct((rows_total, P * d), coords.dtype),
        grid_spec=pltpu.PrefetchScalarGridSpec(
            num_scalar_prefetch=0,
            grid=(grid,),
            in_specs=[
                # Streamed, lane-dense tiles.  (Add pipeline_mode=pl.Buffered(3)
                # here if a profile ever shows exposed DMA at step boundaries.)
                pl.BlockSpec((rows, P * d), lambda i: (i, 0)),    # coords
                pl.BlockSpec((rows, P * C), lambda i: (i, 0)),    # values
                # Resident (constant block index) packed weights / biases.
                pl.BlockSpec((GC, GH), lambda i: (0, 0)),         # kron(I_G, W1)
                pl.BlockSpec((1, GH), lambda i: (0, 0)),          # tiled b1
                pl.BlockSpec((S * GH, P * d), lambda i: (0, 0)),  # kron(I_P, W2)
                pl.BlockSpec((1, P * d), lambda i: (0, 0)),       # tiled b2
            ],
            out_specs=pl.BlockSpec((rows, P * d), lambda i: (i, 0)),
        ),
        # Per-step VMEM is a few MB even at tm=32768 -> fits scoped defaults on
        # v5e (16 MiB), v6e (32 MiB) and v7x (32 MiB of 64 MiB physical).
        compiler_params=pltpu.CompilerParams(
            dimension_semantics=("parallel",),
        ),
        cost_estimate=pl.CostEstimate(
            flops=flops, transcendentals=0, bytes_accessed=bytes_accessed),
    )(coords_g, values_g, w1b, b1b, w2b, b2b)

    # Zero-copy back to (B, N, d); the [:M] slice is a no-op unless padding was used.
    return out_g.reshape(m_pad, d)[:M].reshape(B, N, d)


def _reference(coords, values, w1, b1, w2, b2):
    h = jnp.maximum(values @ w1 + b1, 0.0)
    return coords + (h @ w2 + b2)


if __name__ == "__main__":
    B, N, d = 2, 1024, 2     # 2 batches x 1024 points, 2-D coordinates
    C, H = 8, 32             # value channels, MLP hidden width

    key = jax.random.PRNGKey(0)
    k_coords, k_vals, k_w1, k_b1, k_w2, k_b2 = jax.random.split(key, 6)

    coords = jax.random.uniform(k_coords, (B, N, d), dtype=jnp.float32)
    values = jax.random.normal(k_vals, (B, N, C), dtype=jnp.float32)

    # deterministic parameter init for `self.layers` (pointwise MLP C->H->d)
    w1 = jax.random.normal(k_w1, (C, H), dtype=jnp.float32) * 0.1
    b1 = jax.random.normal(k_b1, (H,), dtype=jnp.float32) * 0.01
    w2 = jax.random.normal(k_w2, (H, d), dtype=jnp.float32) * 0.1
    b2 = jax.random.normal(k_b2, (d,), dtype=jnp.float32) * 0.01

    new_coords = jax.block_until_ready(flow_layer(coords, values, w1, b1, w2, b2))

    ref = _reference(coords, values, w1, b1, w2, b2)
    assert new_coords.shape == coords.shape
    # MLP runs in bf16 with f32 accumulation; the coords add itself is exact f32.
    assert jnp.allclose(new_coords, ref, atol=1e-2, rtol=1e-2)

    # TODO(synk): `self.layers` is caller-supplied in the original module; a
    # pointwise MLP stand-in (values -> Linear(C,H) -> ReLU -> Linear(H,d)) is
    # used here since no concrete sub-module is specified.
    print("KERNEL_OK")
</pallas_src>

<mosaic_0001>
module attributes {stable_mosaic.version = 11 : i64} {
  func.func @kernel(%arg0: i32, %arg1: memref<8x128xf32, #tpu.memory_space<vmem>>, %arg2: memref<8x512xf32, #tpu.memory_space<vmem>>, %arg3: memref<128x512xbf16, #tpu.memory_space<vmem>>, %arg4: memref<1x512xf32, #tpu.memory_space<vmem>>, %arg5: memref<2048x128xbf16, #tpu.memory_space<vmem>>, %arg6: memref<1x128xf32, #tpu.memory_space<vmem>>, %arg7: memref<8x128xf32, #tpu.memory_space<vmem>>) attributes {dimension_semantics = [#tpu.dimension_semantics<parallel>], iteration_bounds = array<i64: 4>, scalar_prefetch = 0 : i64, scratch_operands = 0 : i64, tpu.core_type = #tpu.core_type<tc>, window_params = [{transform_indices = @transform_0, window_bounds = array<i64: 8, 128>}, {transform_indices = @transform_1, window_bounds = array<i64: 8, 512>}, {pipeline_mode = #tpu.pipeline_mode<synchronous>, transform_indices = @transform_2, window_bounds = array<i64: 128, 512>}, {pipeline_mode = #tpu.pipeline_mode<synchronous>, transform_indices = @transform_3, window_bounds = array<i64: 1, 512>}, {pipeline_mode = #tpu.pipeline_mode<synchronous>, transform_indices = @transform_4, window_bounds = array<i64: 2048, 128>}, {pipeline_mode = #tpu.pipeline_mode<synchronous>, transform_indices = @transform_5, window_bounds = array<i64: 1, 128>}, {transform_indices = @transform_6, window_bounds = array<i64: 8, 128>}]} {
    %c0 = arith.constant 0 : index
    %c0_0 = arith.constant 0 : index
    %0 = vector.load %arg1[%c0, %c0_0] : memref<8x128xf32, #tpu.memory_space<vmem>>, vector<8x128xf32>
    %c0_1 = arith.constant 0 : index
    %c0_2 = arith.constant 0 : index
    %1 = vector.load %arg6[%c0_1, %c0_2] : memref<1x128xf32, #tpu.memory_space<vmem>>, vector<1x128xf32>
    %2 = vector.broadcast %1 : vector<1x128xf32> to vector<8x128xf32>
    %3 = arith.addf %0, %2 : vector<8x128xf32>
    %c0_3 = arith.constant 0 : index
    %c0_4 = arith.constant 0 : index
    %4 = vector.load %arg2[%c0_3, %c0_4] : memref<8x512xf32, #tpu.memory_space<vmem>>, vector<8x128xf32>
    %5 = arith.truncf %4 : vector<8x128xf32> to vector<8x128xbf16>
    %c0_5 = arith.constant 0 : index
    %c0_6 = arith.constant 0 : index
    %6 = vector.load %arg3[%c0_5, %c0_6] : memref<128x512xbf16, #tpu.memory_space<vmem>>, vector<128x512xbf16>
    %cst = arith.constant dense<0.000000e+00> : vector<8x512xf32>
    %7 = tpu.matmul %5, %6, %cst {dimension_numbers = #tpu.dot_dimension_numbers<[1], [0], [0], [1], [0, 0, 1, 1], [], []>} : vector<8x128xbf16>, vector<128x512xbf16>, vector<8x512xf32> -> vector<8x512xf32>
    %c0_7 = arith.constant 0 : index
    %c0_8 = arith.constant 0 : index
    %8 = vector.load %arg4[%c0_7, %c0_8] : memref<1x512xf32, #tpu.memory_space<vmem>>, vector<1x512xf32>
    %9 = vector.broadcast %8 : vector<1x512xf32> to vector<8x512xf32>
    %10 = arith.addf %7, %9 : vector<8x512xf32>
    %cst_9 = arith.constant 0.000000e+00 : f32
    %11 = vector.broadcast %cst_9 : f32 to vector<8x512xf32>
    %12 = arith.maximumf %10, %11 : vector<8x512xf32>
    %13 = arith.truncf %12 : vector<8x512xf32> to vector<8x512xbf16>
    %c0_10 = arith.constant 0 : index
    %c0_11 = arith.constant 0 : index
    %14 = vector.load %arg5[%c0_10, %c0_11] : memref<2048x128xbf16, #tpu.memory_space<vmem>>, vector<512x128xbf16>
    %cst_12 = arith.constant dense<0.000000e+00> : vector<8x128xf32>
    %15 = tpu.matmul %13, %14, %cst_12 {dimension_numbers = #tpu.dot_dimension_numbers<[1], [0], [0], [1], [0, 0, 1, 1], [], []>} : vector<8x512xbf16>, vector<512x128xbf16>, vector<8x128xf32> -> vector<8x128xf32>
    %16 = arith.addf %3, %15 : vector<8x128xf32>
    %c0_13 = arith.constant 0 : index
    %c128 = arith.constant 128 : index
    %17 = vector.load %arg2[%c0_13, %c128] : memref<8x512xf32, #tpu.memory_space<vmem>>, vector<8x128xf32>
    %18 = arith.truncf %17 : vector<8x128xf32> to vector<8x128xbf16>
    %c0_14 = arith.constant 0 : index
    %c0_15 = arith.constant 0 : index
    %19 = vector.load %arg3[%c0_14, %c0_15] : memref<128x512xbf16, #tpu.memory_space<vmem>>, vector<128x512xbf16>
    %cst_16 = arith.constant dense<0.000000e+00> : vector<8x512xf32>
    %20 = tpu.matmul %18, %19, %cst_16 {dimension_numbers = #tpu.dot_dimension_numbers<[1], [0], [0], [1], [0, 0, 1, 1], [], []>} : vector<8x128xbf16>, vector<128x512xbf16>, vector<8x512xf32> -> vector<8x512xf32>
    %c0_17 = arith.constant 0 : index
    %c0_18 = arith.constant 0 : index
    %21 = vector.load %arg4[%c0_17, %c0_18] : memref<1x512xf32, #tpu.memory_space<vmem>>, vector<1x512xf32>
    %22 = vector.broadcast %21 : vector<1x512xf32> to vector<8x512xf32>
    %23 = arith.addf %20, %22 : vector<8x512xf32>
    %cst_19 = arith.constant 0.000000e+00 : f32
    %24 = vector.broadcast %cst_19 : f32 to vector<8x512xf32>
    %25 = arith.maximumf %23, %24 : vector<8x512xf32>
    %26 = arith.truncf %25 : vector<8x512xf32> to vector<8x512xbf16>
    %c512 = arith.constant 512 : index
    %c0_20 = arith.constant 0 : index
    %27 = vector.load %arg5[%c512, %c0_20] : memref<2048x128xbf16, #tpu.memory_space<vmem>>, vector<512x128xbf16>
    %cst_21 = arith.constant dense<0.000000e+00> : vector<8x128xf32>
    %28 = tpu.matmul %26, %27, %cst_21 {dimension_numbers = #tpu.dot_dimension_numbers<[1], [0], [0], [1], [0, 0, 1, 1], [], []>} : vector<8x512xbf16>, vector<512x128xbf16>, vector<8x128xf32> -> vector<8x128xf32>
    %29 = arith.addf %16, %28 : vector<8x128xf32>
    %c0_22 = arith.constant 0 : index
    %c256 = arith.constant 256 : index
    %30 = vector.load %arg2[%c0_22, %c256] : memref<8x512xf32, #tpu.memory_space<vmem>>, vector<8x128xf32>
    %31 = arith.truncf %30 : vector<8x128xf32> to vector<8x128xbf16>
    %c0_23 = arith.constant 0 : index
    %c0_24 = arith.constant 0 : index
    %32 = vector.load %arg3[%c0_23, %c0_24] : memref<128x512xbf16, #tpu.memory_space<vmem>>, vector<128x512xbf16>
    %cst_25 = arith.constant dense<0.000000e+00> : vector<8x512xf32>
    %33 = tpu.matmul %31, %32, %cst_25 {dimension_numbers = #tpu.dot_dimension_numbers<[1], [0], [0], [1], [0, 0, 1, 1], [], []>} : vector<8x128xbf16>, vector<128x512xbf16>, vector<8x512xf32> -> vector<8x512xf32>
    %c0_26 = arith.constant 0 : index
    %c0_27 = arith.constant 0 : index
    %34 = vector.load %arg4[%c0_26, %c0_27] : memref<1x512xf32, #tpu.memory_space<vmem>>, vector<1x512xf32>
    %35 = vector.broadcast %34 : vector<1x512xf32> to vector<8x512xf32>
    %36 = arith.addf %33, %35 : vector<8x512xf32>
    %cst_28 = arith.constant 0.000000e+00 : f32
    %37 = vector.broadcast %cst_28 : f32 to vector<8x512xf32>
    %38 = arith.maximumf %36, %37 : vector<8x512xf32>
    %39 = arith.truncf %38 : vector<8x512xf32> to vector<8x512xbf16>
    %c1024 = arith.constant 1024 : index
    %c0_29 = arith.constant 0 : index
    %40 = vector.load %arg5[%c1024, %c0_29] : memref<2048x128xbf16, #tpu.memory_space<vmem>>, vector<512x128xbf16>
    %cst_30 = arith.constant dense<0.000000e+00> : vector<8x128xf32>
    %41 = tpu.matmul %39, %40, %cst_30 {dimension_numbers = #tpu.dot_dimension_numbers<[1], [0], [0], [1], [0, 0, 1, 1], [], []>} : vector<8x512xbf16>, vector<512x128xbf16>, vector<8x128xf32> -> vector<8x128xf32>
    %42 = arith.addf %29, %41 : vector<8x128xf32>
    %c0_31 = arith.constant 0 : index
    %c384 = arith.constant 384 : index
    %43 = vector.load %arg2[%c0_31, %c384] : memref<8x512xf32, #tpu.memory_space<vmem>>, vector<8x128xf32>
    %44 = arith.truncf %43 : vector<8x128xf32> to vector<8x128xbf16>
    %c0_32 = arith.constant 0 : index
    %c0_33 = arith.constant 0 : index
    %45 = vector.load %arg3[%c0_32, %c0_33] : memref<128x512xbf16, #tpu.memory_space<vmem>>, vector<128x512xbf16>
    %cst_34 = arith.constant dense<0.000000e+00> : vector<8x512xf32>
    %46 = tpu.matmul %44, %45, %cst_34 {dimension_numbers = #tpu.dot_dimension_numbers<[1], [0], [0], [1], [0, 0, 1, 1], [], []>} : vector<8x128xbf16>, vector<128x512xbf16>, vector<8x512xf32> -> vector<8x512xf32>
    %c0_35 = arith.constant 0 : index
    %c0_36 = arith.constant 0 : index
    %47 = vector.load %arg4[%c0_35, %c0_36] : memref<1x512xf32, #tpu.memory_space<vmem>>, vector<1x512xf32>
    %48 = vector.broadcast %47 : vector<1x512xf32> to vector<8x512xf32>
    %49 = arith.addf %46, %48 : vector<8x512xf32>
    %cst_37 = arith.constant 0.000000e+00 : f32
    %50 = vector.broadcast %cst_37 : f32 to vector<8x512xf32>
    %51 = arith.maximumf %49, %50 : vector<8x512xf32>
    %52 = arith.truncf %51 : vector<8x512xf32> to vector<8x512xbf16>
    %c1536 = arith.constant 1536 : index
    %c0_38 = arith.constant 0 : index
    %53 = vector.load %arg5[%c1536, %c0_38] : memref<2048x128xbf16, #tpu.memory_space<vmem>>, vector<512x128xbf16>
    %cst_39 = arith.constant dense<0.000000e+00> : vector<8x128xf32>
    %54 = tpu.matmul %52, %53, %cst_39 {dimension_numbers = #tpu.dot_dimension_numbers<[1], [0], [0], [1], [0, 0, 1, 1], [], []>} : vector<8x512xbf16>, vector<512x128xbf16>, vector<8x128xf32> -> vector<8x128xf32>
    %55 = arith.addf %42, %54 : vector<8x128xf32>
    %c0_40 = arith.constant 0 : index
    %c0_41 = arith.constant 0 : index
    %56 = vector.load %arg7[%c0_40, %c0_41] : memref<8x128xf32, #tpu.memory_space<vmem>>, vector<8x128xf32>
    tpu.vector_store %arg7[%c0_40, %c0_41], %55 {strides = array<i32>} : memref<8x128xf32, #tpu.memory_space<vmem>>, vector<8x128xf32>,
    return
  }
  func.func @transform_0(%arg0: i32) -> (i32, i32) {
    %c0_i32 = arith.constant 0 : i32
    %c0_i32_0 = arith.constant 0 : i32
    return %arg0, %c0_i32 : i32, i32
  }
  func.func @transform_1(%arg0: i32) -> (i32, i32) {
    %c0_i32 = arith.constant 0 : i32
    %c0_i32_0 = arith.constant 0 : i32
    return %arg0, %c0_i32 : i32, i32
  }
  func.func @transform_2(%arg0: i32) -> (i32, i32) {
    %c0_i32 = arith.constant 0 : i32
    %c0_i32_0 = arith.constant 0 : i32
    %c0_i32_1 = arith.constant 0 : i32
    return %c0_i32, %c0_i32_0 : i32, i32
  }
  func.func @transform_3(%arg0: i32) -> (i32, i32) {
    %c0_i32 = arith.constant 0 : i32
    %c0_i32_0 = arith.constant 0 : i32
    %c0_i32_1 = arith.constant 0 : i32
    return %c0_i32, %c0_i32_0 : i32, i32
  }
  func.func @transform_4(%arg0: i32) -> (i32, i32) {
    %c0_i32 = arith.constant 0 : i32
    %c0_i32_0 = arith.constant 0 : i32
    %c0_i32_1 = arith.constant 0 : i32
    return %c0_i32, %c0_i32_0 : i32, i32
  }
  func.func @transform_5(%arg0: i32) -> (i32, i32) {
    %c0_i32 = arith.constant 0 : i32
    %c0_i32_0 = arith.constant 0 : i32
    %c0_i32_1 = arith.constant 0 : i32
    return %c0_i32, %c0_i32_0 : i32, i32
  }
  func.func @transform_6(%arg0: i32) -> (i32, i32) {
    %c0_i32 = arith.constant 0 : i32
    %c0_i32_0 = arith.constant 0 : i32
    return %arg0, %c0_i32 : i32, i32
  }
}

</mosaic_0001>

<bundles_post_ra>
// kernel: tpu_custom_call.1
= control target key start
LH: loop header
LB: loop body
LE: loop exit
PB: predicated region body
PF: predicated region fallthrough
CT: control target
= control target key end

     0   :  { %s3807_s0 = inlined_call_operand.hbm [shape: f32[32,128], index: 0, kind: input, shape index: {}]   ;;  %s3808_s1 = inlined_call_operand.hbm [shape: f32[32,512], index: 1, kind: input, shape index: {}]   ;;  %s3809_s2 = inlined_call_operand.hbm [shape: bf16[128,512], index: 2, kind: input, shape index: {}]   ;;  %s3810_s3 = inlined_call_operand.vmem [shape: f32[1,512], index: 3, kind: input, shape index: {}]   ;;  %s3811_s4 = inlined_call_operand.hbm [shape: bf16[2048,128], index: 4, kind: input, shape index: {}]   ;;  %s3812_s5 = inlined_call_operand.vmem [shape: f32[1,128], index: 5, kind: input, shape index: {}]   ;;  %s3813_s6 = inlined_call_operand.hbm [shape: f32[32,128], index: 6, kind: output, shape index: {}]  }
   0x1   :  { %3818 = sst [smem:[#allocation16_spill]] %s3807_s0 }
   0x2   :  { %3819 = sst [smem:[#allocation17_spill]] %s3809_s2 }
   0x3   :  { %11 = vsyncpa [#allocation3], 0 }
   0x4   :  { %13 = vsyncpa [#allocation3 + $0x1], 0 }
   0x5   :  { %14 = vsyncpa [#allocation6], 0 }
   0x6   :  { %16 = vsyncpa [#allocation6 + $0x1], 0 }
   0x7   :  { %17 = vsyncpa [#allocation9], 0 }
   0x8   :  { %18 = vsyncpa [#allocation4], 0 }
   0x9   :  { %20 = vsyncpa [#allocation4 + $0x1], 0  ;;  %s3275_s21 = smov 0   ;;  %s3277_s22 = smov 0  }
   0xa   :  { %s3279_s23 = smov 0   ;;  %s3281_s24 = smov 0  }
   0xb LB: > { %s3296_s25 = sadd.s32 4294967295, %s3228_s24   ;;  %s2401_s26 = sadd.s32 4294967294, %s3228_s24   ;;  %s3228_s24 = sphi %s3281_s24, %s3842_s24   ;;  %s3224_s23 = sphi %s3279_s23, %s3841_s23   ;;  %s3220_s22 = sphi %s3277_s22, %s3840_s22   ;;  %s3216_s21 = sphi %s3275_s21, %s3839_s21  }
   0xc   : > { %p46_p0 = scmp.ne.s32.totalorder %s3220_s22, %s3216_s21  ;;  %p3814_p1 = scmp.eq.s32.totalorder %s3296_s25, 0 }
   0xd   : > { %p186_p3 = scmp.eq.s32.totalorder %s2401_s26, 3  ;;  %p2402_p5 = scmp.ge.s32.totalorder %s3228_s24, 1 }
   0xe   : > { %p3305_p4 = por %p3814_p1, %p46_p0  ;;  %p193_p7 = scmp.lt.s32.totalorder %s3228_s24, 5 }
   0xf   : > { %p3310_p6 = por %p186_p3, %p46_p0  ;;  %s3230_s30 = smov [#allocation7]  }
  0x10   : > { %s3820_s27 = scalar_select %p3305_p4, 1, 0 }
  0x11   : > { %s3821_s28 = scalar_select %p3310_p6, 1, 0 }
  0x12   : > { %p3315_p8 = pnand %p2402_p5, %p193_p7  ;;  %s205_s7 = sshll.u32 %s3230_s30, 4  ;;  %s206_s7 = int_to_ptr.vmem [resolvable:$true] %s205_s7 }
  0x13   : > { %s3231_s9 = smov [#allocation8]   ;;  %s3055_s11 = scalar_lea.vmem %s206_s7, 4096 }
  0x14   : > { %s3822_s29 = scalar_select %p3315_p8, 1, 0 }
  0x15   : > { %p2773_p9 = pneg %p3315_p8  ;;  %s221_s10 = sshll.u32 %s3231_s9, 4  ;;  %s222_s10 = int_to_ptr.vmem [resolvable:$true] %s221_s10 }
  0x16   : > { %p3056_p12 = scmp.ne.s32.totalorder %s206_s7, %s3055_s11  ;;  %p3063_p3 = scmp.lt.s32.totalorder %s206_s7, %s206_s7 }
  0x17   : > { %p3323_p10 = pnand %p2773_p9, %p3814_p1  ;;  %p3064_p5 = scmp.lt.s32.totalorder %s3055_s11, %s3055_s11 }
  0x19   : > { %p3046_p11 = pneg %p3323_p10  ;;  %p3065_p7 = por %p3064_p5, %p3063_p3 }
  0x1b   : > { %p3058_p13 = pnand %p3056_p12, %p3046_p11 }
  0x1d   : > { %p3059_p0 = pneg %p3058_p13 }
  0x1f   : > { %p3066_p9 = pnand %p3065_p7, %p3059_p0 }
  0x21   : > { %3069 = shalt.err (!%p3066_p9)
}
  0x22   : > { %s3232_s12 = smov 256   ;;  %s3233_s13 = smov 16  }
  0x23   : > { %s3824_s2 = sld [smem:[#allocation17_spill]]  ;;  %s3081_s16 = scalar_lea.vmem %s222_s10, 16384 }
  0x24   : > { %p3082_p1 = scmp.ne.s32.totalorder %s222_s10, %s3081_s16  ;;  %p3089_p2 = scmp.lt.s32.totalorder %s222_s10, %s222_s10 }
  0x25   : > { %p3090_p6 = scmp.lt.s32.totalorder %s3081_s16, %s3081_s16 }
  0x26   : > { %p3084_p12 = pnand %p3082_p1, %p3046_p11 }
  0x27   : > { %p3091_p3 = por %p3090_p6, %p3089_p2 }
  0x28   : > { %p3085_p13 = pneg %p3084_p12 }
  0x29   : > { %2776 = dma.hbm_to_vmem [thread:$0]  (!%p3323_p10), %s3824_s2, 4096, %s206_s7, [#allocation6], %s3232_s12, %s3232_s12, %s3233_s13  }
  0x2a   : > { %p3092_p0 = pnand %p3091_p3, %p3085_p13 }
  0x2c   : > { %3095 = shalt.err (!%p3092_p0)
}
  0x2d   : > { %s3234_s17 = smov 64   ;;  %s3235_s18 = smov 4  }
  0x2e   : > { %2779 = dma.hbm_to_vmem [thread:$0]  (!%p3323_p10), %s3811_s4, 16384, %s222_s10, [#allocation9], %s3234_s17, %s3234_s17, %s3235_s18  }
  0x2f   : > { %s3346_s26 = sadd.s32 1, %s3228_s24   ;;  %s33_s7 = sadd.s32 1, %s3224_s23 }
  0x30   : > { %s30_s30 = ssub.s32 %s3228_s24, %s3346_s26  ;;  %p40_p2 = scmp.ne.s32.totalorder %s3224_s23, %s3220_s22 }
  0x31   : > { %p31_p1 = scmp.eq.s32.totalorder %s30_s30, 0  ;;  %p41_p6 = scmp.eq.s32.totalorder %s3228_s24, 0 }
  0x32   : > { %p3825_p5 = scmp.eq.s32.totalorder %s3296_s25, 3  ;;  %p2793_p9 = scmp.lt.s32.totalorder %s3228_s24, 4 }
  0x33   : > { %s3355_s9 = scalar_select %p31_p1, %s3224_s23, %s33_s7  }
  0x34   : > { %p42_p11 = por %p41_p6, %p40_p2  ;;  %p3359_p7 = por %p3825_p5, %p40_p2 }
  0x35   : > { %s3365_s8 = sand.u32 1, %s3224_s23   ;;  %s2407_s12 = sshll.u32 %s3228_s24, 7 }
  0x36   : > { %s3826_s11 = scalar_select %p3359_p7, 1, 0 }
  0x37   : > { %s2406_s10 = sshll.u32 %s3365_s8, 3  ;;  %s3827_s0 = sld [smem:[#allocation16_spill]] }
  0x38   : > { %s242_s16 = scalar_lea.vmem [#allocation2], %s2406_s10  ;;  %p3376_p10 = pnand %p2793_p9, %p42_p11 }
  0x39   : > { %s249_s17 = sshll.u32 %s242_s16, 4  ;;  %s239_s30 = scalar_lea.sflag [#allocation3], %s3365_s8  ;;  %s3374_s17 = int_to_ptr.vmem [resolvable:$true] %s249_s17 }
  0x3a   : > { %p3098_p13 = pneg %p3376_p10 }
  0x3d   : > { %s3372_s15 = scalar_lea.hbm %s3827_s0, %s2407_s12  ;;  %s3101_s13 = scalar_lea.hbm %s3827_s0, 512 }
  0x3e   : > { %s3096_s7 = scalar_lea.hbm %s3372_s15, 128  ;;  %p3102_p1 = scmp.lt.s32.totalorder %s3372_s15, %s3827_s0 }
  0x3f   : > { %p3097_p12 = scmp.ne.s32.totalorder %s3372_s15, %s3096_s7  ;;  %p3103_p2 = scmp.lt.s32.totalorder %s3101_s13, %s3096_s7 }
  0x41   : > { %p3099_p3 = pnand %p3098_p13, %p3097_p12  ;;  %p3104_p6 = por %p3103_p2, %p3102_p1 }
  0x43   : > { %p3100_p0 = pneg %p3099_p3 }
  0x45   : > { %p3105_p11 = pnand %p3104_p6, %p3100_p0 }
  0x47   : > { %3108 = shalt.err (!%p3105_p11)
}
  0x48   : > { %s3109_s19 = scalar_lea.vmem %s3374_s17, 128  ;;  %s3236_s10 = smov [#allocation2]  }
  0x49   : > { %p3110_p5 = scmp.ne.s32.totalorder %s3374_s17, %s3109_s19  ;;  %s3114_s12 = sshll.u32 %s3236_s10, 4  ;;  %s3115_s12 = int_to_ptr.vmem [resolvable:$false] %s3114_s12 }
  0x4a   : > { %s3116_s20 = scalar_lea.vmem %s3115_s12, 256  ;;  %p3117_p3 = scmp.lt.s32.totalorder %s3374_s17, %s3115_s12 }
  0x4b   : > { %p3112_p9 = pnand %p3110_p5, %p3098_p13  ;;  %p3118_p7 = scmp.lt.s32.totalorder %s3116_s20, %s3109_s19 }
  0x4d   : > { %p3113_p12 = pneg %p3112_p9  ;;  %p3119_p4 = por %p3118_p7, %p3117_p3 }
  0x4f   : > { %p3120_p1 = pnand %p3119_p4, %p3113_p12 }
  0x51   : > { %3123 = shalt.err (!%p3120_p1)
}
  0x52   : > { %2783 = dma.hbm_to_vmem [thread:$0]  (!%p3376_p10), %s3372_s15, 128, %s3374_s17, %s239_s30  }
  0x53   : > { %s2582_s7 = sshll.u32 %s3228_s24, 9  ;;  %s3829_s10 = sshll.u32 %s3365_s8, 5 }
  0x54   : > { %s3411_s16 = scalar_lea.hbm %s3808_s1, %s2582_s7  ;;  %s260_s19 = scalar_lea.vmem [#allocation5], %s3829_s10 }
  0x55   : > { %s268_s20 = sshll.u32 %s260_s19, 4  ;;  %s3830_s12 = sand.u32 1, %s3228_s24   ;;  %s269_s20 = int_to_ptr.vmem [resolvable:$true] %s268_s20 }
  0x56   : > { %s257_s0 = scalar_lea.sflag [#allocation6], %s3830_s12  ;;  %s3124_s2 = scalar_lea.hbm %s3411_s16, 512 }
  0x57   : > { %p3125_p4 = scmp.ne.s32.totalorder %s3411_s16, %s3124_s2  ;;  %s3129_s30 = scalar_lea.hbm %s3808_s1, 2048 }
  0x58   : > { %p3130_p2 = scmp.lt.s32.totalorder %s3411_s16, %s3808_s1  ;;  %p3131_p6 = scmp.lt.s32.totalorder %s3129_s30, %s3124_s2 }
  0x59   : > { %p3127_p7 = pnand %p3125_p4, %p3098_p13 }
  0x5a   : > { %p3132_p11 = por %p3131_p6, %p3130_p2 }
  0x5b   : > { %p3128_p0 = pneg %p3127_p7 }
  0x5d   : > { %p3133_p5 = pnand %p3132_p11, %p3128_p0 }
  0x5f   : > { %3136 = shalt.err (!%p3133_p5)
}
  0x60   : > { %s3137_s13 = scalar_lea.vmem %s269_s20, 512  ;;  %s3237_s14 = smov [#allocation5]  }
  0x61   : > { %p3138_p9 = scmp.ne.s32.totalorder %s269_s20, %s3137_s13  ;;  %s3142_s10 = sshll.u32 %s3237_s14, 4  ;;  %s3143_s10 = int_to_ptr.vmem [resolvable:$false] %s3142_s10 }
  0x62   : > { %s3144_s19 = scalar_lea.vmem %s3143_s10, 1024  ;;  %p3145_p1 = scmp.lt.s32.totalorder %s269_s20, %s3143_s10 }
  0x63   : > { %p3140_p12 = pnand %p3138_p9, %p3098_p13  ;;  %p3146_p4 = scmp.lt.s32.totalorder %s3144_s19, %s3137_s13 }
  0x65   : > { %p3141_p3 = pneg %p3140_p12  ;;  %p3147_p7 = por %p3146_p4, %p3145_p1 }
  0x67   : > { %p3148_p8 = pnand %p3147_p7, %p3141_p3 }
  0x69   : > { %3151 = shalt.err (!%p3148_p8)
}
  0x6a   : > { %2786 = dma.hbm_to_vmem [thread:$0]  (!%p3376_p10), %s3411_s16, 512, %s269_s20, %s257_s0  }
  0x6b   : > { %p3831_p0 = scmp.ne.s32.totalorder %s3822_s29, 0 }
  0x6c   : > { %s3438_s2 = sand.u32 (!%p3831_p0), 1, %s3220_s22   ;;  %p3832_p8 = scmp.ne.s32.totalorder (!%p3831_p0), %s3820_s27, 0 }
  0x6d   : > { %277 = sbr.rel (%p3831_p0) target bundleno = 1276 (0x4fc), region = 44  ;;  %s2412_s12 = sshll.u32 (!%p3831_p0), %s3438_s2, 3 }
  0x6e   : > { %s280_s15 = scalar_lea.sflag (!%p3831_p0), [#allocation3], %s3438_s2  ;;  %s3444_s17 = scalar_lea.vmem (!%p3831_p0), [#allocation2], %s2412_s12 }
  0x72   : > { %3195 = dma.done.wait (%p3832_p8), %s280_s15, 128  }
  0x73   : > { %3197 = vsyncadd (%p3832_p8), %s280_s15, 4294967168  ;;  %s288_s0 = sand.u32 1, %s3296_s25   ;;  %s2413_s29 = sshll.u32 %s3438_s2, 5 }
  0x74   : > { %s289_s18 = scalar_lea.sflag [#allocation6], %s288_s0  ;;  %s3452_s16 = scalar_lea.vmem [#allocation5], %s2413_s29 }
  0x75   : > { %3199 = dma.done.wait (%p3832_p8), %s289_s18, 512  }
  0x76   : > { %3201 = vsyncadd (%p3832_p8), %s289_s18, 4294966784  ;;  %p3833_p10 = scmp.eq.s32.totalorder %s3296_s25, 0 }
  0x78   : > { %3203 = dma.done.wait (%p3833_p10), [#allocation6], 4096   ;;  %p3834_p13 = pmov %p3833_p10 }
  0x79   : > { %p3835_p2 = pmov %p3833_p10 }
  0x7a   : > { %3205 = vsyncadd (%p3834_p13), [#allocation6], 4294963200 }
  0x7b   : > { %3207 = dma.done.wait (%p3835_p2), [#allocation9], 16384   ;;  %p3836_p6 = pmov %p3835_p2 }
  0x7c   : > { %v3238_v0 = vmov 0   ;;  %v3468_v1 = vld [vmem:[#allocation7 + $0xe4] ss:$16 sps:$4 sm:$0xff]   ;;  %v3470_v2 = vld [vmem:[#allocation7 + $0xec] ss:$16 sps:$4 sm:$0xff]   ;;  %s2579_s8 = sshll.u32 %s3296_s25, 7 }
  0x7d   : > { %3209 = vsyncadd (%p3836_p6), [#allocation9], 4294950912  ;;  %592 = vmatprep.mubr.bf16.mxu0 %v3238_v0  ;;  %633 = vmatprep.mubr.bf16.mxu1 %v3238_v0  ;;  %v3473_v3 = vld [vmem:[#allocation7 + $0xe0] ss:$16 sps:$4 sm:$0xff]   ;;  %v3475_v4 = vld [vmem:[#allocation7 + $0xe8] ss:$16 sps:$4 sm:$0xff]   ;;  %s2287_s15 = scalar_lea.hbm %s3813_s6, %s2579_s8 }
  0x7e   : > { %560 = vmatprep.subr.bf16.mxu0 %v3468_v1  ;;  %601 = vmatprep.subr.bf16.mxu1 %v3470_v2  ;;  %v3478_v5 = vld [vmem:[#allocation7 + $0xc4] ss:$16 sps:$4 sm:$0xff]   ;;  %v3482_v6 = vld [vmem:[#allocation7 + $0xcc] ss:$16 sps:$4 sm:$0xff]   ;;  %v3484_v7 = vld [vmem:[#allocation7 + $0xc0] ss:$16 sps:$4 sm:$0xff]  }
  0x7f   : > { %561 = vmatpush1.bf16.msra.mxu0 %v3473_v3  ;;  %602 = vmatpush1.bf16.msra.mxu1 %v3475_v4  ;;  %v3487_v8 = vld [vmem:[#allocation7 + $0xc8] ss:$16 sps:$4 sm:$0xff]   ;;  %v3490_v9 = vld [vmem:[#allocation7 + $0xa4] ss:$16 sps:$4 sm:$0xff]   ;;  %v3492_v10 = vld [vmem:[#allocation7 + $0xac] ss:$16 sps:$4 sm:$0xff]  }
  0x80   : > { %562 = vmatprep.subr.bf16.mxu0 %v3478_v5  ;;  %603 = vmatprep.subr.bf16.mxu1 %v3482_v6  ;;  %v3494_v11 = vld [vmem:[#allocation7 + $0xa0] ss:$16 sps:$4 sm:$0xff]   ;;  %v3496_v12 = vld [vmem:[#allocation7 + $0xa8] ss:$16 sps:$4 sm:$0xff]   ;;  %v3500_v13 = vld [vmem:[#allocation7 + $0x84] ss:$16 sps:$4 sm:$0xff]  }
  0x81   : > { %v3504_v14 = vld [vmem:[#allocation7 + $0x8c] ss:$16 sps:$4 sm:$0xff]   ;;  %v3506_v15 = vld [vmem:[#allocation7 + $0x80] ss:$16 sps:$4 sm:$0xff]   ;;  %v3510_v16 = vld [vmem:[#allocation7 + $0x88] ss:$16 sps:$4 sm:$0xff]  }
  0x82   : > { %v3512_v17 = vld [vmem:[#allocation7 + $0x64] ss:$16 sps:$4 sm:$0xff]   ;;  %v3516_v18 = vld [vmem:[#allocation7 + $0x6c] ss:$16 sps:$4 sm:$0xff]   ;;  %v3518_v19 = vld [vmem:[#allocation7 + $0x60] ss:$16 sps:$4 sm:$0xff]  }
  0x83   : > { %563 = vmatpush1.bf16.msra.mxu0 %v3484_v7  ;;  %604 = vmatpush1.bf16.msra.mxu1 %v3487_v8  ;;  %v3520_v20 = vld [vmem:[#allocation7 + $0x68] ss:$16 sps:$4 sm:$0xff]   ;;  %v3524_v21 = vld [vmem:[#allocation7 + $0x44] ss:$16 sps:$4 sm:$0xff]   ;;  %v3528_v22 = vld [vmem:[#allocation7 + $0x4c] ss:$16 sps:$4 sm:$0xff]  }
  0x84   : > { %564 = vmatprep.subr.bf16.mxu0 %v3490_v9  ;;  %605 = vmatprep.subr.bf16.mxu1 %v3492_v10  ;;  %v3532_v23 = vld [vmem:[#allocation7 + $0x40] ss:$16 sps:$4 sm:$0xff]   ;;  %v3534_v24 = vld [vmem:[#allocation7 + $0x48] ss:$16 sps:$4 sm:$0xff]   ;;  %v3538_v25 = vld [vmem:[#allocation7 + $0x24] ss:$16 sps:$4 sm:$0xff]  }
  0x85   : > { %v3540_v26 = vld [vmem:[#allocation7 + $0x2c] ss:$16 sps:$4 sm:$0xff]   ;;  %v3542_v27 = vld [vmem:[#allocation7 + $0x20] ss:$16 sps:$4 sm:$0xff]   ;;  %v3544_v28 = vld [vmem:[#allocation7 + $0x28] ss:$16 sps:$4 sm:$0xff]  }
  0x86   : > { %v3548_v29 = vld [vmem:[#allocation7 + $0x4] ss:$16 sps:$4 sm:$0xff]   ;;  %v3552_v30 = vld [vmem:[#allocation7 + $0xc] ss:$16 sps:$4 sm:$0xff]   ;;  %v3554_v31 = vld [vmem:[#allocation7] ss:$16 sps:$4 sm:$0xff]  }
  0x87   : > { %565 = vmatpush1.bf16.msra.mxu0 %v3494_v11  ;;  %606 = vmatpush1.bf16.msra.mxu1 %v3496_v12  ;;  %v3556_v32 = vld [vmem:[#allocation7 + $0x8] ss:$16 sps:$4 sm:$0xff]   ;;  %v344_v33 = vld [vmem:[%s3452_s16] sm:$0xff]  ;;  %v2888_v39 = vld [vmem:[#allocation8 + $0x70] sm:$0xff]   ;;  %s333_s13 = scalar_lea.vmem [#allocation10], %s2412_s12  ;;  %p3837_p5 = scmp.ne.s32.totalorder %s3826_s11, 0 }
  0x88   : > { %566 = vmatprep.subr.bf16.mxu0 %v3500_v13  ;;  %607 = vmatprep.subr.bf16.mxu1 %v3504_v14  ;;  %v2884_v34 = vld [vmem:[#allocation8 + $0x78] sm:$0xff]   ;;  %v345_v37 = vpack.c.bf16 %v344_v33, %v344_v33  ;;  %v2889_v40 = vld [vmem:[#allocation8 + $0xf0] sm:$0xff]   ;;  %v2892_v43 = vld [vmem:[#allocation8 + $0x68] sm:$0xff]   ;;  %s2289_s14 = sshll.u32 %s333_s13, 4  ;;  %s3239_s25 = smov [#allocation10]   ;;  %s2290_s14 = int_to_ptr.vmem [resolvable:$true] %s2289_s14 }
  0x89   : > { %v2885_v35 = vld [vmem:[#allocation8 + $0xf8] sm:$0xff]   ;;  %v2890_v41 = vld [vmem:[#allocation8 + $0x30] sm:$0xff]   ;;  %v2893_v44 = vld [vmem:[#allocation8 + $0xe8] sm:$0xff]   ;;  %s3152_s0 = scalar_lea.vmem %s2290_s14, 128  ;;  %s3156_s29 = sshll.u32 %s3239_s25, 4  ;;  %s3157_s29 = int_to_ptr.vmem [resolvable:$false] %s3156_s29 }
  0x8a   : > { %v2886_v36 = vld [vmem:[#allocation8 + $0x38] sm:$0xff]   ;;  %v2891_v42 = vld [vmem:[#allocation8 + $0xb0] sm:$0xff]   ;;  %v2894_v45 = vld [vmem:[#allocation8 + $0x28] sm:$0xff]   ;;  %p3153_p11 = scmp.ne.s32.totalorder %s2290_s14, %s3152_s0  ;;  %s3158_s12 = scalar_lea.vmem %s3157_s29, 256 }
  0x8b   : > { %567 = vmatpush1.bf16.msra.mxu0 %v3506_v15  ;;  %608 = vmatpush1.bf16.msra.mxu1 %v3510_v16  ;;  %v2887_v38 = vld [vmem:[#allocation8 + $0xb8] sm:$0xff]   ;;  %v2895_v46 = vld [vmem:[#allocation8 + $0xa8] sm:$0xff]   ;;  %v2896_v47 = vld [vmem:[#allocation8 + $0x60] sm:$0xff]   ;;  %p3159_p3 = scmp.lt.s32.totalorder %s2290_s14, %s3157_s29  ;;  %p3160_p1 = scmp.lt.s32.totalorder %s3158_s12, %s3152_s0 }
  0x8c   : > { %568 = vmatprep.subr.bf16.mxu0 %v3512_v17  ;;  %609 = vmatprep.subr.bf16.mxu1 %v3516_v18  ;;  %v2897_v48 = vld [vmem:[#allocation8 + $0xe0] sm:$0xff]   ;;  %v2900_v51 = vld [vmem:[#allocation8 + $0x58] sm:$0xff]   ;;  %v2904_v55 = vld [vmem:[#allocation8 + $0x50] sm:$0xff]   ;;  %p3154_p9 = pnand %p3153_p11, %p3837_p5 }
  0x8d   : > { %v2898_v49 = vld [vmem:[#allocation8 + $0x20] sm:$0xff]   ;;  %v2901_v52 = vld [vmem:[#allocation8 + $0xd8] sm:$0xff]   ;;  %v2905_v56 = vld [vmem:[#allocation8 + $0xd0] sm:$0xff]   ;;  %p3161_p4 = por %p3160_p1, %p3159_p3 }
  0x8e   : > { %v2899_v50 = vld [vmem:[#allocation8 + $0xa0] sm:$0xff]   ;;  %v2902_v53 = vld [vmem:[#allocation8 + $0x18] sm:$0xff]   ;;  %v2906_v57 = vld [vmem:[#allocation8 + $0x10] sm:$0xff]   ;;  %p3155_p12 = pneg %p3154_p9 }
  0x8f   : > { %569 = vmatpush1.bf16.msra.mxu0 %v3518_v19  ;;  %610 = vmatpush1.bf16.msra.mxu1 %v3520_v20  ;;  %v2903_v54 = vld [vmem:[#allocation8 + $0x98] sm:$0xff]   ;;  %v2907_v58 = vld [vmem:[#allocation8 + $0x90] sm:$0xff]   ;;  %v2908_v59 = vld [vmem:[#allocation8 + $0x48] sm:$0xff]  }
  0x90   : > { %570 = vmatprep.subr.bf16.mxu0 %v3524_v21  ;;  %611 = vmatprep.subr.bf16.mxu1 %v3528_v22  ;;  %v2909_v60 = vld [vmem:[#allocation8 + $0xc8] sm:$0xff]   ;;  %v2912_v63 = vld [vmem:[#allocation8 + $0x40] sm:$0xff]   ;;  %p3162_p7 = pnand %p3161_p4, %p3155_p12 }
  0x91   : > { %v2910_v61 = vld [vmem:[#allocation8 + $0x8] sm:$0xff]   ;;  %v2913_v33 = vld [vmem:[#allocation8 + $0xc0] sm:$0xff]  }
  0x92   : > { %v2911_v62 = vld [vmem:[#allocation8 + $0x88] sm:$0xff]  }
  0x93   : > { %571 = vmatpush1.bf16.msra.mxu0 %v3532_v23  ;;  %612 = vmatpush1.bf16.msra.mxu1 %v3534_v24 }
  0x94   : > { %572 = vmatprep.subr.bf16.mxu0 %v3538_v25  ;;  %613 = vmatprep.subr.bf16.mxu1 %v3540_v26 }
  0x97   : > { %573 = vmatpush1.bf16.msra.mxu0 %v3542_v27  ;;  %614 = vmatpush1.bf16.msra.mxu1 %v3544_v28 }
  0x98   : > { %574 = vmatprep.subr.bf16.mxu0 %v3548_v29  ;;  %615 = vmatprep.subr.bf16.mxu1 %v3552_v30 }
  0x9b   : > { %575 = vmatpush1.bf16.msra.mxu0 %v3554_v31  ;;  %616 = vmatpush1.bf16.msra.mxu1 %v3556_v32 }
  0x9c   : > { %2583 = vmatprep.subr.bf16.mxu0 %v2884_v34  ;;  %2605 = vmatprep.subr.bf16.mxu1 %v2885_v35  ;;  %v2914_v34 = vld [vmem:[#allocation8] sm:$0xff]  }
  0x9d   : > { %v2915_v35 = vld [vmem:[#allocation8 + $0x80] sm:$0xff]  }
  0x9e   : > { %593 = vmatmul.mubr.bf16.vlgmr.msra.gmra.mxu0 %v345_v37  ;;  %634 = vmatmul.mubr.bf16.vlgmr.msra.gmra.mxu1 %v345_v37 }
  0x9f   : > { %2584 = vmatpush3.bf16.msra.mxu0 %v2886_v36  ;;  %2606 = vmatpush3.bf16.msra.mxu1 %v2887_v38  ;;  %v380_v36 = vlaneseq }
  0xa0   : > { %2585 = vmatprep.subr.bf16.mxu0 %v2888_v39  ;;  %2607 = vmatprep.subr.bf16.mxu1 %v2889_v40  ;;  %v378_v40 = vld [vmem:[%s3810_s3] sm:$0xf] }
  0xa1   : > { %v381_v37 = vshrl.u32 %v380_v36, 7  ;;  %v2946_v36 = vld [vmem:[#allocation8 + $0x100] sm:$0xff]  }
  0xa3   : > { %2586 = vmatpush3.bf16.msra.mxu0 %v2890_v41  ;;  %2608 = vmatpush3.bf16.msra.mxu1 %v2891_v42  ;;  %v382_v38 = vsub.s32 0, %v381_v37  ;;  %v390_v39 = vsub.s32 2, %v381_v37  ;;  %v386_v41 = vsub.s32 1, %v381_v37  ;;  %v394_v42 = vsub.s32 3, %v381_v37  ;;  %v2947_v37 = vld [vmem:[#allocation8 + $0x180] sm:$0xff]  }
  0xa4   : > { %2587 = vmatprep.subr.bf16.mxu0 %v2892_v43  ;;  %2609 = vmatprep.subr.bf16.mxu1 %v2893_v44 }
  0xa5   : > { %v3570_v43 = vrot.slane %v378_v40, %v382_v38  ;;  %v3572_v44 = vrot.slane %v378_v40, %v390_v39  ;;  %v3615_v38 = vld [vmem:[#allocation7 + $0xe4] ss:$16 sps:$4 sm:$0xff]   ;;  %v3618_v39 = vld [vmem:[#allocation7 + $0xec] ss:$16 sps:$4 sm:$0xff]  }
  0xa7   : > { %2588 = vmatpush3.bf16.msra.mxu0 %v2894_v45  ;;  %2610 = vmatpush3.bf16.msra.mxu1 %v2895_v46  ;;  %v3574_v45 = vrot.slane %v378_v40, %v386_v41  ;;  %v3576_v46 = vrot.slane %v378_v40, %v394_v42 }
  0xa8   : > { %2589 = vmatprep.subr.bf16.mxu0 %v2896_v47  ;;  %2611 = vmatprep.subr.bf16.mxu1 %v2897_v48 }
  0xab   : > { %2590 = vmatpush3.bf16.msra.mxu0 %v2898_v49  ;;  %2612 = vmatpush3.bf16.msra.mxu1 %v2899_v50 }
  0xac   : > { %2591 = vmatprep.subr.bf16.mxu0 %v2900_v51  ;;  %2613 = vmatprep.subr.bf16.mxu1 %v2901_v52 }
  0xaf   : > { %2592 = vmatpush3.bf16.msra.mxu0 %v2902_v53  ;;  %2614 = vmatpush3.bf16.msra.mxu1 %v2903_v54 }
  0xb0   : > { %2593 = vmatprep.subr.bf16.mxu0 %v2904_v55  ;;  %2615 = vmatprep.subr.bf16.mxu1 %v2905_v56 }
  0xb3   : > { %2594 = vmatpush3.bf16.msra.mxu0 %v2906_v57  ;;  %2616 = vmatpush3.bf16.msra.mxu1 %v2907_v58 }
  0xb4   : > { %2595 = vmatprep.subr.bf16.mxu0 %v2908_v59  ;;  %2617 = vmatprep.subr.bf16.mxu1 %v2909_v60 }
  0xb7   : > { %2596 = vmatpush3.bf16.msra.mxu0 %v2910_v61  ;;  %2618 = vmatpush3.bf16.msra.mxu1 %v2911_v62 }
  0xb8   : > { %2597 = vmatprep.subr.bf16.mxu0 %v2912_v63  ;;  %2619 = vmatprep.subr.bf16.mxu1 %v2913_v33 }
  0xbb   : > { %2598 = vmatpush3.bf16.msra.mxu0 %v2914_v34  ;;  %2620 = vmatpush3.bf16.msra.mxu1 %v2915_v35  ;;  %v2944_v34 = vld [vmem:[#allocation8 + $0x140] sm:$0xff]  }
  0xbc   : > { %989 = vmatprep.subr.bf16.mxu0 %v3468_v1  ;;  %1030 = vmatprep.subr.bf16.mxu1 %v3470_v2  ;;  %v2945_v35 = vld [vmem:[#allocation8 + $0x1c0] sm:$0xff]  }
 0x15e   : > { %v594_v1 = vpop.f32.mrf.mxu0  ;;  %v635_v2 = vpop.f32.mrf.mxu1 }
 0x15f   : > { %v595_v47 = vadd.f32 %v594_v1, %v3570_v43  ;;  %v636_v48 = vadd.f32 %v635_v2, %v3572_v44 }
 0x160   : > { %v596_v49 = vpop.f32.mrf.mxu0  ;;  %v637_v50 = vpop.f32.mrf.mxu1 }
 0x161   : > { %v597_v51 = vadd.f32 %v596_v49, %v3574_v45  ;;  %v638_v52 = vadd.f32 %v637_v50, %v3576_v46  ;;  %v642_v53 = vmax.f32 %v595_v47, 0.0  ;;  %v644_v54 = vmax.f32 %v636_v48, 0.0 }
 0x162   : > { %v598_v55 = vpop.f32.mrf.mxu0  ;;  %v639_v56 = vpop.f32.mrf.mxu1 }
 0x163   : > { %v643_v57 = vmax.f32 %v597_v51, 0.0  ;;  %v645_v58 = vmax.f32 %v638_v52, 0.0  ;;  %v646_v63 = vpack.c.bf16 %v642_v53, %v642_v53  ;;  %v648_v33 = vpack.c.bf16 %v644_v54, %v644_v54 }
 0x164   : > { %v599_v59 = vpop.f32.mrf.mxu0  ;;  %v640_v60 = vpop.f32.mrf.mxu1 }
 0x165   : > { %v647_v61 = vpack.c.bf16 %v643_v57, %v643_v57  ;;  %v649_v62 = vpack.c.bf16 %v645_v58, %v645_v58 }
 0x167   : > { %938 = vmatprep.mubr.bf16.mxu0 %v647_v61  ;;  %978 = vmatprep.mubr.bf16.mxu1 %v649_v62 }
 0x168   : > { %939 = vmatmul.mubr.bf16.vlgmr.msra.gmra.mxu0 %v646_v63  ;;  %979 = vmatmul.mubr.bf16.vlgmr.msra.gmra.mxu1 %v648_v33 }
 0x169   : > { %990 = vmatpush1.bf16.msra.mxu0 %v3473_v3  ;;  %1031 = vmatpush1.bf16.msra.mxu1 %v3475_v4  ;;  %v987_v3 = vld [vmem:[%s3452_s16 + $0x8] sm:$0xff] }
 0x16a   : > { %991 = vmatprep.subr.bf16.mxu0 %v3478_v5  ;;  %1032 = vmatprep.subr.bf16.mxu1 %v3482_v6  ;;  %v988_v4 = vpack.c.bf16 %v987_v3, %v987_v3  ;;  %v2916_v5 = vld [vmem:[#allocation8 + $0x178] sm:$0xff]  }
 0x16b   : > { %1021 = vmatprep.mubr.bf16.mxu0 %v3238_v0  ;;  %1062 = vmatprep.mubr.bf16.mxu1 %v3238_v0  ;;  %v2917_v6 = vld [vmem:[#allocation8 + $0x1f8] sm:$0xff]  }
 0x16d   : > { %992 = vmatpush1.bf16.msra.mxu0 %v3484_v7  ;;  %1033 = vmatpush1.bf16.msra.mxu1 %v3487_v8  ;;  %v2918_v7 = vld [vmem:[#allocation8 + $0x138] sm:$0xff]  }
 0x16e   : > { %993 = vmatprep.subr.bf16.mxu0 %v3490_v9  ;;  %1034 = vmatprep.subr.bf16.mxu1 %v3492_v10  ;;  %v2919_v8 = vld [vmem:[#allocation8 + $0x1b8] sm:$0xff]   ;;  %v2920_v9 = vld [vmem:[#allocation8 + $0x170] sm:$0xff]  }
 0x16f   : > { %v2921_v10 = vld [vmem:[#allocation8 + $0x1f0] sm:$0xff]  }
 0x171   : > { %994 = vmatpush1.bf16.msra.mxu0 %v3494_v11  ;;  %1035 = vmatpush1.bf16.msra.mxu1 %v3496_v12  ;;  %v2922_v11 = vld [vmem:[#allocation8 + $0x130] sm:$0xff]  }
 0x172   : > { %995 = vmatprep.subr.bf16.mxu0 %v3500_v13  ;;  %1036 = vmatprep.subr.bf16.mxu1 %v3504_v14  ;;  %v2923_v12 = vld [vmem:[#allocation8 + $0x1b0] sm:$0xff]   ;;  %v2924_v13 = vld [vmem:[#allocation8 + $0x168] sm:$0xff]  }
 0x173   : > { %v2925_v14 = vld [vmem:[#allocation8 + $0x1e8] sm:$0xff]  }
 0x175   : > { %996 = vmatpush1.bf16.msra.mxu0 %v3506_v15  ;;  %1037 = vmatpush1.bf16.msra.mxu1 %v3510_v16  ;;  %v2926_v15 = vld [vmem:[#allocation8 + $0x128] sm:$0xff]  }
 0x176   : > { %997 = vmatprep.subr.bf16.mxu0 %v3512_v17  ;;  %1038 = vmatprep.subr.bf16.mxu1 %v3516_v18  ;;  %v2927_v16 = vld [vmem:[#allocation8 + $0x1a8] sm:$0xff]   ;;  %v2928_v17 = vld [vmem:[#allocation8 + $0x160] sm:$0xff]  }
 0x177   : > { %v2929_v18 = vld [vmem:[#allocation8 + $0x1e0] sm:$0xff]  }
 0x179   : > { %998 = vmatpush1.bf16.msra.mxu0 %v3518_v19  ;;  %1039 = vmatpush1.bf16.msra.mxu1 %v3520_v20  ;;  %v2930_v19 = vld [vmem:[#allocation8 + $0x120] sm:$0xff]  }
 0x17a   : > { %999 = vmatprep.subr.bf16.mxu0 %v3524_v21  ;;  %1040 = vmatprep.subr.bf16.mxu1 %v3528_v22  ;;  %v2931_v20 = vld [vmem:[#allocation8 + $0x1a0] sm:$0xff]   ;;  %v2932_v21 = vld [vmem:[#allocation8 + $0x158] sm:$0xff]  }
 0x17b   : > { %v2933_v22 = vld [vmem:[#allocation8 + $0x1d8] sm:$0xff]  }
 0x17d   : > { %1000 = vmatpush1.bf16.msra.mxu0 %v3532_v23  ;;  %1041 = vmatpush1.bf16.msra.mxu1 %v3534_v24  ;;  %v2934_v23 = vld [vmem:[#allocation8 + $0x118] sm:$0xff]  }
 0x17e   : > { %1001 = vmatprep.subr.bf16.mxu0 %v3538_v25  ;;  %1042 = vmatprep.subr.bf16.mxu1 %v3540_v26  ;;  %v2935_v24 = vld [vmem:[#allocation8 + $0x198] sm:$0xff]   ;;  %v2936_v25 = vld [vmem:[#allocation8 + $0x150] sm:$0xff]  }
 0x17f   : > { %v2937_v26 = vld [vmem:[#allocation8 + $0x1d0] sm:$0xff]  }
 0x181   : > { %1002 = vmatpush1.bf16.msra.mxu0 %v3542_v27  ;;  %1043 = vmatpush1.bf16.msra.mxu1 %v3544_v28  ;;  %v2938_v27 = vld [vmem:[#allocation8 + $0x110] sm:$0xff]  }
 0x182   : > { %1003 = vmatprep.subr.bf16.mxu0 %v3548_v29  ;;  %1044 = vmatprep.subr.bf16.mxu1 %v3552_v30  ;;  %v2939_v28 = vld [vmem:[#allocation8 + $0x190] sm:$0xff]   ;;  %v2940_v29 = vld [vmem:[#allocation8 + $0x148] sm:$0xff]  }
 0x183   : > { %v2941_v30 = vld [vmem:[#allocation8 + $0x1c8] sm:$0xff]  }
 0x185   : > { %1004 = vmatpush1.bf16.msra.mxu0 %v3554_v31  ;;  %1045 = vmatpush1.bf16.msra.mxu1 %v3556_v32  ;;  %v2942_v31 = vld [vmem:[#allocation8 + $0x108] sm:$0xff]  }
 0x186   : > { %2627 = vmatprep.subr.bf16.mxu0 %v2916_v5  ;;  %2649 = vmatprep.subr.bf16.mxu1 %v2917_v6  ;;  %v2943_v32 = vld [vmem:[#allocation8 + $0x188] sm:$0xff]  }
 0x188   : > { %1022 = vmatmul.mubr.bf16.vlgmr.msra.gmra.mxu0 %v988_v4  ;;  %1063 = vmatmul.mubr.bf16.vlgmr.msra.gmra.mxu1 %v988_v4 }
 0x189   : > { %2628 = vmatpush3.bf16.msra.mxu0 %v2918_v7  ;;  %2650 = vmatpush3.bf16.msra.mxu1 %v2919_v8 }
 0x18a   : > { %2629 = vmatprep.subr.bf16.mxu0 %v2920_v9  ;;  %2651 = vmatprep.subr.bf16.mxu1 %v2921_v10 }
 0x18d   : > { %2630 = vmatpush3.bf16.msra.mxu0 %v2922_v11  ;;  %2652 = vmatpush3.bf16.msra.mxu1 %v2923_v12  ;;  %v3627_v11 = vld [vmem:[#allocation7 + $0xe0] ss:$16 sps:$4 sm:$0xff]   ;;  %v3630_v12 = vld [vmem:[#allocation7 + $0xe8] ss:$16 sps:$4 sm:$0xff]  }
 0x18e   : > { %2631 = vmatprep.subr.bf16.mxu0 %v2924_v13  ;;  %2653 = vmatprep.subr.bf16.mxu1 %v2925_v14  ;;  %v3633_v13 = vld [vmem:[#allocation7 + $0xc4] ss:$16 sps:$4 sm:$0xff]   ;;  %v3636_v14 = vld [vmem:[#allocation7 + $0xcc] ss:$16 sps:$4 sm:$0xff]  }
 0x191   : > { %2632 = vmatpush3.bf16.msra.mxu0 %v2926_v15  ;;  %2654 = vmatpush3.bf16.msra.mxu1 %v2927_v16  ;;  %v3641_v15 = vld [vmem:[#allocation7 + $0xc0] ss:$16 sps:$4 sm:$0xff]   ;;  %v3644_v16 = vld [vmem:[#allocation7 + $0xc8] ss:$16 sps:$4 sm:$0xff]  }
 0x192   : > { %2633 = vmatprep.subr.bf16.mxu0 %v2928_v17  ;;  %2655 = vmatprep.subr.bf16.mxu1 %v2929_v18  ;;  %v3647_v17 = vld [vmem:[#allocation7 + $0xa4] ss:$16 sps:$4 sm:$0xff]   ;;  %v3650_v18 = vld [vmem:[#allocation7 + $0xac] ss:$16 sps:$4 sm:$0xff]  }
 0x195   : > { %2634 = vmatpush3.bf16.msra.mxu0 %v2930_v19  ;;  %2656 = vmatpush3.bf16.msra.mxu1 %v2931_v20  ;;  %v3653_v19 = vld [vmem:[#allocation7 + $0xa0] ss:$16 sps:$4 sm:$0xff]   ;;  %v3656_v20 = vld [vmem:[#allocation7 + $0xa8] ss:$16 sps:$4 sm:$0xff]  }
 0x196   : > { %2635 = vmatprep.subr.bf16.mxu0 %v2932_v21  ;;  %2657 = vmatprep.subr.bf16.mxu1 %v2933_v22  ;;  %v3659_v21 = vld [vmem:[#allocation7 + $0x84] ss:$16 sps:$4 sm:$0xff]   ;;  %v3662_v22 = vld [vmem:[#allocation7 + $0x8c] ss:$16 sps:$4 sm:$0xff]  }
 0x199   : > { %2636 = vmatpush3.bf16.msra.mxu0 %v2934_v23  ;;  %2658 = vmatpush3.bf16.msra.mxu1 %v2935_v24  ;;  %v3665_v23 = vld [vmem:[#allocation7 + $0x80] ss:$16 sps:$4 sm:$0xff]   ;;  %v3668_v24 = vld [vmem:[#allocation7 + $0x88] ss:$16 sps:$4 sm:$0xff]  }
 0x19a   : > { %2637 = vmatprep.subr.bf16.mxu0 %v2936_v25  ;;  %2659 = vmatprep.subr.bf16.mxu1 %v2937_v26  ;;  %v3671_v25 = vld [vmem:[#allocation7 + $0x64] ss:$16 sps:$4 sm:$0xff]   ;;  %v3674_v26 = vld [vmem:[#allocation7 + $0x6c] ss:$16 sps:$4 sm:$0xff]  }
 0x19d   : > { %2638 = vmatpush3.bf16.msra.mxu0 %v2938_v27  ;;  %2660 = vmatpush3.bf16.msra.mxu1 %v2939_v28  ;;  %v3677_v27 = vld [vmem:[#allocation7 + $0x60] ss:$16 sps:$4 sm:$0xff]   ;;  %v3680_v28 = vld [vmem:[#allocation7 + $0x68] ss:$16 sps:$4 sm:$0xff]  }
 0x19e   : > { %2639 = vmatprep.subr.bf16.mxu0 %v2940_v29  ;;  %2661 = vmatprep.subr.bf16.mxu1 %v2941_v30  ;;  %v3683_v29 = vld [vmem:[#allocation7 + $0x44] ss:$16 sps:$4 sm:$0xff]   ;;  %v3686_v30 = vld [vmem:[#allocation7 + $0x4c] ss:$16 sps:$4 sm:$0xff]  }
 0x1a1   : > { %2640 = vmatpush3.bf16.msra.mxu0 %v2942_v31  ;;  %2662 = vmatpush3.bf16.msra.mxu1 %v2943_v32  ;;  %v3689_v31 = vld [vmem:[#allocation7 + $0x40] ss:$16 sps:$4 sm:$0xff]   ;;  %v3692_v32 = vld [vmem:[#allocation7 + $0x48] ss:$16 sps:$4 sm:$0xff]  }
 0x1a2   : > { %2641 = vmatprep.subr.bf16.mxu0 %v2944_v34  ;;  %2663 = vmatprep.subr.bf16.mxu1 %v2945_v35  ;;  %v3695_v34 = vld [vmem:[#allocation7 + $0x24] ss:$16 sps:$4 sm:$0xff]   ;;  %v3698_v35 = vld [vmem:[#allocation7 + $0x2c] ss:$16 sps:$4 sm:$0xff]  }
 0x1a5   : > { %2642 = vmatpush3.bf16.msra.mxu0 %v2946_v36  ;;  %2664 = vmatpush3.bf16.msra.mxu1 %v2947_v37  ;;  %v3701_v36 = vld [vmem:[#allocation7 + $0x20] ss:$16 sps:$4 sm:$0xff]   ;;  %v3704_v37 = vld [vmem:[#allocation7 + $0x28] ss:$16 sps:$4 sm:$0xff]  }
 0x1a6   : > { %1418 = vmatprep.subr.bf16.mxu0 %v3615_v38  ;;  %1459 = vmatprep.subr.bf16.mxu1 %v3618_v39 }
 0x228   : > { %v2599_v40 = vpop.f32.mrf.mxu0  ;;  %v2621_v41 = vpop.f32.mrf.mxu1 }
 0x22a   : > { %v2600_v42 = vpop.f32.mrf.mxu0  ;;  %v2622_v1 = vpop.f32.mrf.mxu1 }
 0x22b   : > { %v2601_v2 = vadd.f32 %v2600_v42, %v2599_v40  ;;  %v2623_v47 = vadd.f32 %v2622_v1, %v2621_v41  ;;  %v1416_v40 = vld [vmem:[%s3452_s16 + $0x10] sm:$0xff]  ;;  %v3711_v42 = vld [vmem:[#allocation7 + $0xc] ss:$16 sps:$4 sm:$0xff]  }
 0x22c   : > { %v2602_v48 = vpop.f32.mrf.mxu0  ;;  %v2624_v49 = vpop.f32.mrf.mxu1  ;;  %v3708_v41 = vld [vmem:[#allocation7 + $0x4] ss:$16 sps:$4 sm:$0xff]   ;;  %v1417_v1 = vpack.c.bf16 %v1416_v40, %v1416_v40  ;;  %v2972_v40 = vld [vmem:[#allocation8 + $0x248] sm:$0xff]  }
 0x22d   : > { %v3621_v50 = vadd.f32 %v2623_v47, %v2601_v2  ;;  %v3714_v2 = vld [vmem:[#allocation7] ss:$16 sps:$4 sm:$0xff]   ;;  %v3717_v47 = vld [vmem:[#allocation7 + $0x8] ss:$16 sps:$4 sm:$0xff]  }
 0x22e   : > { %v2603_v51 = vpop.f32.mrf.mxu0  ;;  %v2625_v52 = vpop.f32.mrf.mxu1  ;;  %v2948_v48 = vld [vmem:[#allocation8 + $0x278] sm:$0xff]  }
 0x22f   : > { %v2949_v49 = vld [vmem:[#allocation8 + $0x2f8] sm:$0xff]  }
 0x230   : > { %v2950_v51 = vld [vmem:[#allocation8 + $0x238] sm:$0xff]  }
 0x231   : > { %v2951_v52 = vld [vmem:[#allocation8 + $0x2b8] sm:$0xff]  }
 0x248   : > { %v1023_v53 = vpop.f32.mrf.mxu0  ;;  %v1064_v54 = vpop.f32.mrf.mxu1 }
 0x249   : > { %v1024_v55 = vadd.f32 %v1023_v53, %v3570_v43  ;;  %v1065_v56 = vadd.f32 %v1064_v54, %v3572_v44  ;;  %v2952_v53 = vld [vmem:[#allocation8 + $0x270] sm:$0xff]  }
 0x24a   : > { %v1025_v57 = vpop.f32.mrf.mxu0  ;;  %v1066_v58 = vpop.f32.mrf.mxu1  ;;  %v2953_v54 = vld [vmem:[#allocation8 + $0x2f0] sm:$0xff]  }
 0x24b   : > { %v1026_v59 = vadd.f32 %v1025_v57, %v3574_v45  ;;  %v1067_v60 = vadd.f32 %v1066_v58, %v3576_v46  ;;  %v1071_v61 = vmax.f32 %v1024_v55, 0.0  ;;  %v1073_v62 = vmax.f32 %v1065_v56, 0.0  ;;  %v2954_v55 = vld [vmem:[#allocation8 + $0x230] sm:$0xff]   ;;  %v2956_v57 = vld [vmem:[#allocation8 + $0x268] sm:$0xff]  }
 0x24c   : > { %v1027_v63 = vpop.f32.mrf.mxu0  ;;  %v1068_v33 = vpop.f32.mrf.mxu1  ;;  %v2955_v56 = vld [vmem:[#allocation8 + $0x2b0] sm:$0xff]   ;;  %v2957_v58 = vld [vmem:[#allocation8 + $0x2e8] sm:$0xff]  }
 0x24d   : > { %v1072_v3 = vmax.f32 %v1026_v59, 0.0  ;;  %v1074_v4 = vmax.f32 %v1067_v60, 0.0  ;;  %v1075_v9 = vpack.c.bf16 %v1071_v61, %v1071_v61  ;;  %v1077_v10 = vpack.c.bf16 %v1073_v62, %v1073_v62  ;;  %v2958_v59 = vld [vmem:[#allocation8 + $0x228] sm:$0xff]   ;;  %v2960_v61 = vld [vmem:[#allocation8 + $0x260] sm:$0xff]  }
 0x24e   : > { %v1028_v5 = vpop.f32.mrf.mxu0  ;;  %v1069_v6 = vpop.f32.mrf.mxu1  ;;  %v2959_v60 = vld [vmem:[#allocation8 + $0x2a8] sm:$0xff]   ;;  %v2961_v62 = vld [vmem:[#allocation8 + $0x2e0] sm:$0xff]  }
 0x24f   : > { %v1076_v7 = vpack.c.bf16 %v1072_v3, %v1072_v3  ;;  %v1078_v8 = vpack.c.bf16 %v1074_v4, %v1074_v4  ;;  %v2962_v63 = vld [vmem:[#allocation8 + $0x220] sm:$0xff]   ;;  %v2964_v3 = vld [vmem:[#allocation8 + $0x258] sm:$0xff]  }
 0x250   : > { %v2963_v33 = vld [vmem:[#allocation8 + $0x2a0] sm:$0xff]   ;;  %v2965_v4 = vld [vmem:[#allocation8 + $0x2d8] sm:$0xff]  }
 0x251   : > { %1367 = vmatprep.mubr.bf16.mxu0 %v1076_v7  ;;  %1407 = vmatprep.mubr.bf16.mxu1 %v1078_v8  ;;  %v2966_v5 = vld [vmem:[#allocation8 + $0x218] sm:$0xff]   ;;  %v2968_v7 = vld [vmem:[#allocation8 + $0x250] sm:$0xff]  }
 0x252   : > { %1368 = vmatmul.mubr.bf16.vlgmr.msra.gmra.mxu0 %v1075_v9  ;;  %1408 = vmatmul.mubr.bf16.vlgmr.msra.gmra.mxu1 %v1077_v10  ;;  %v2967_v6 = vld [vmem:[#allocation8 + $0x298] sm:$0xff]   ;;  %v2969_v8 = vld [vmem:[#allocation8 + $0x2d0] sm:$0xff]  }
 0x253   : > { %1419 = vmatpush1.bf16.msra.mxu0 %v3627_v11  ;;  %1460 = vmatpush1.bf16.msra.mxu1 %v3630_v12  ;;  %v2970_v9 = vld [vmem:[#allocation8 + $0x210] sm:$0xff]  }
 0x254   : > { %1420 = vmatprep.subr.bf16.mxu0 %v3633_v13  ;;  %1461 = vmatprep.subr.bf16.mxu1 %v3636_v14  ;;  %v2971_v10 = vld [vmem:[#allocation8 + $0x290] sm:$0xff]  }
 0x255   : > { %1450 = vmatprep.mubr.bf16.mxu0 %v3238_v0  ;;  %1491 = vmatprep.mubr.bf16.mxu1 %v3238_v0 }
 0x257   : > { %1421 = vmatpush1.bf16.msra.mxu0 %v3641_v15  ;;  %1462 = vmatpush1.bf16.msra.mxu1 %v3644_v16 }
 0x258   : > { %1422 = vmatprep.subr.bf16.mxu0 %v3647_v17  ;;  %1463 = vmatprep.subr.bf16.mxu1 %v3650_v18 }
 0x25b   : > { %1423 = vmatpush1.bf16.msra.mxu0 %v3653_v19  ;;  %1464 = vmatpush1.bf16.msra.mxu1 %v3656_v20 }
 0x25c   : > { %1424 = vmatprep.subr.bf16.mxu0 %v3659_v21  ;;  %1465 = vmatprep.subr.bf16.mxu1 %v3662_v22 }
 0x25f   : > { %1425 = vmatpush1.bf16.msra.mxu0 %v3665_v23  ;;  %1466 = vmatpush1.bf16.msra.mxu1 %v3668_v24 }
 0x260   : > { %1426 = vmatprep.subr.bf16.mxu0 %v3671_v25  ;;  %1467 = vmatprep.subr.bf16.mxu1 %v3674_v26 }
 0x263   : > { %1427 = vmatpush1.bf16.msra.mxu0 %v3677_v27  ;;  %1468 = vmatpush1.bf16.msra.mxu1 %v3680_v28 }
 0x264   : > { %1428 = vmatprep.subr.bf16.mxu0 %v3683_v29  ;;  %1469 = vmatprep.subr.bf16.mxu1 %v3686_v30 }
 0x267   : > { %1429 = vmatpush1.bf16.msra.mxu0 %v3689_v31  ;;  %1470 = vmatpush1.bf16.msra.mxu1 %v3692_v32 }
 0x268   : > { %1430 = vmatprep.subr.bf16.mxu0 %v3695_v34  ;;  %1471 = vmatprep.subr.bf16.mxu1 %v3698_v35 }
 0x26b   : > { %1431 = vmatpush1.bf16.msra.mxu0 %v3701_v36  ;;  %1472 = vmatpush1.bf16.msra.mxu1 %v3704_v37 }
 0x26c   : > { %1432 = vmatprep.subr.bf16.mxu0 %v3708_v41  ;;  %1473 = vmatprep.subr.bf16.mxu1 %v3711_v42 }
 0x26f   : > { %1433 = vmatpush1.bf16.msra.mxu0 %v3714_v2  ;;  %1474 = vmatpush1.bf16.msra.mxu1 %v3717_v47 }
 0x270   : > { %2671 = vmatprep.subr.bf16.mxu0 %v2948_v48  ;;  %2693 = vmatprep.subr.bf16.mxu1 %v2949_v49  ;;  %v2974_v48 = vld [vmem:[#allocation8 + $0x208] sm:$0xff]  }
 0x271   : > { %v2975_v49 = vld [vmem:[#allocation8 + $0x288] sm:$0xff]  }
 0x272   : > { %1451 = vmatmul.mubr.bf16.vlgmr.msra.gmra.mxu0 %v1417_v1  ;;  %1492 = vmatmul.mubr.bf16.vlgmr.msra.gmra.mxu1 %v1417_v1  ;;  %v2973_v1 = vld [vmem:[#allocation8 + $0x2c8] sm:$0xff]  }
 0x273   : > { %2672 = vmatpush3.bf16.msra.mxu0 %v2950_v51  ;;  %2694 = vmatpush3.bf16.msra.mxu1 %v2951_v52  ;;  %v2976_v51 = vld [vmem:[#allocation8 + $0x240] sm:$0xff]  }
 0x274   : > { %2673 = vmatprep.subr.bf16.mxu0 %v2952_v53  ;;  %2695 = vmatprep.subr.bf16.mxu1 %v2953_v54  ;;  %v2977_v52 = vld [vmem:[#allocation8 + $0x2c0] sm:$0xff]  }
 0x275   : > { %v2978_v53 = vld [vmem:[#allocation8 + $0x200] sm:$0xff]  }
 0x276   : > { %v2979_v54 = vld [vmem:[#allocation8 + $0x280] sm:$0xff]  }
 0x277   : > { %2674 = vmatpush3.bf16.msra.mxu0 %v2954_v55  ;;  %2696 = vmatpush3.bf16.msra.mxu1 %v2955_v56  ;;  %v335_v55 = vld [vmem:[%s3444_s17] sm:$0xff]  ;;  %s2276_s17 = scalar_lea.sflag [#allocation4], %s3438_s2 }
 0x278   : > { %2675 = vmatprep.subr.bf16.mxu0 %v2956_v57  ;;  %2697 = vmatprep.subr.bf16.mxu1 %v2957_v58  ;;  %v2417_v56 = vld [vmem:[%s3812_s5] ss:$0 sm:$0xff] }
 0x27b   : > { %2676 = vmatpush3.bf16.msra.mxu0 %v2958_v59  ;;  %2698 = vmatpush3.bf16.msra.mxu1 %v2959_v60  ;;  %v343_v59 = vadd.f32 %v2417_v56, %v335_v55 }
 0x27c   : > { %2677 = vmatprep.subr.bf16.mxu0 %v2960_v61  ;;  %2699 = vmatprep.subr.bf16.mxu1 %v2961_v62 }
 0x27f   : > { %2678 = vmatpush3.bf16.msra.mxu0 %v2962_v63  ;;  %2700 = vmatpush3.bf16.msra.mxu1 %v2963_v33 }
 0x280   : > { %2679 = vmatprep.subr.bf16.mxu0 %v2964_v3  ;;  %2701 = vmatprep.subr.bf16.mxu1 %v2965_v4  ;;  %v986_v4 = vadd.f32 %v3621_v50, %v343_v59 }
 0x283   : > { %2680 = vmatpush3.bf16.msra.mxu0 %v2966_v5  ;;  %2702 = vmatpush3.bf16.msra.mxu1 %v2967_v6 }
 0x284   : > { %2681 = vmatprep.subr.bf16.mxu0 %v2968_v7  ;;  %2703 = vmatprep.subr.bf16.mxu1 %v2969_v8 }
 0x287   : > { %2682 = vmatpush3.bf16.msra.mxu0 %v2970_v9  ;;  %2704 = vmatpush3.bf16.msra.mxu1 %v2971_v10 }
 0x288   : > { %2683 = vmatprep.subr.bf16.mxu0 %v2972_v40  ;;  %2705 = vmatprep.subr.bf16.mxu1 %v2973_v1 }
 0x28b   : > { %2684 = vmatpush3.bf16.msra.mxu0 %v2974_v48  ;;  %2706 = vmatpush3.bf16.msra.mxu1 %v2975_v49 }
 0x28c   : > { %2685 = vmatprep.subr.bf16.mxu0 %v2976_v51  ;;  %2707 = vmatprep.subr.bf16.mxu1 %v2977_v52 }
 0x28f   : > { %2686 = vmatpush3.bf16.msra.mxu0 %v2978_v53  ;;  %2708 = vmatpush3.bf16.msra.mxu1 %v2979_v54 }
 0x290   : > { %1847 = vmatprep.subr.bf16.mxu0 %v3615_v38  ;;  %1888 = vmatprep.subr.bf16.mxu1 %v3618_v39 }
 0x312   : > { %v2643_v57 = vpop.f32.mrf.mxu0  ;;  %v2665_v58 = vpop.f32.mrf.mxu1 }
 0x314   : > { %v2644_v60 = vpop.f32.mrf.mxu0  ;;  %v2666_v61 = vpop.f32.mrf.mxu1 }
 0x315   : > { %v2645_v62 = vadd.f32 %v2644_v60, %v2643_v57  ;;  %v2667_v63 = vadd.f32 %v2666_v61, %v2665_v58 }
 0x316   : > { %v2646_v33 = vpop.f32.mrf.mxu0  ;;  %v2668_v3 = vpop.f32.mrf.mxu1 }
 0x317   : > { %v1410_v5 = vadd.f32 %v2667_v63, %v2645_v62  ;;  %v3009_v62 = vld [vmem:[#allocation8 + $0x3c0] sm:$0xff]  }
 0x318   : > { %v2647_v38 = vpop.f32.mrf.mxu0  ;;  %v2669_v6 = vpop.f32.mrf.mxu1  ;;  %v3010_v63 = vld [vmem:[#allocation8 + $0x300] sm:$0xff]  }
 0x319   : > { %v3727_v39 = vadd.f32 %v1410_v5, %v986_v4  ;;  %v3011_v33 = vld [vmem:[#allocation8 + $0x380] sm:$0xff]  }
 0x332   : > { %v1452_v7 = vpop.f32.mrf.mxu0  ;;  %v1493_v8 = vpop.f32.mrf.mxu1 }
 0x333   : > { %v1453_v9 = vadd.f32 %v1452_v7, %v3570_v43  ;;  %v1494_v10 = vadd.f32 %v1493_v8, %v3572_v44 }
 0x334   : > { %v1454_v40 = vpop.f32.mrf.mxu0  ;;  %v1495_v1 = vpop.f32.mrf.mxu1 }
 0x335   : > { %v1455_v48 = vadd.f32 %v1454_v40, %v3574_v45  ;;  %v1496_v49 = vadd.f32 %v1495_v1, %v3576_v46  ;;  %v1500_v51 = vmax.f32 %v1453_v9, 0.0  ;;  %v1502_v52 = vmax.f32 %v1494_v10, 0.0 }
 0x336   : > { %v1456_v50 = vpop.f32.mrf.mxu0  ;;  %v1497_v53 = vpop.f32.mrf.mxu1 }
 0x337   : > { %v1501_v54 = vmax.f32 %v1455_v48, 0.0  ;;  %v1503_v55 = vmax.f32 %v1496_v49, 0.0  ;;  %v1504_v60 = vpack.c.bf16 %v1500_v51, %v1500_v51  ;;  %v1506_v61 = vpack.c.bf16 %v1502_v52, %v1502_v52 }
 0x338   : > { %v1457_v56 = vpop.f32.mrf.mxu0  ;;  %v1498_v57 = vpop.f32.mrf.mxu1 }
 0x339   : > { %v1505_v58 = vpack.c.bf16 %v1501_v54, %v1501_v54  ;;  %v1507_v59 = vpack.c.bf16 %v1503_v55, %v1503_v55 }
 0x33b   : > { %1796 = vmatprep.mubr.bf16.mxu0 %v1505_v58  ;;  %1836 = vmatprep.mubr.bf16.mxu1 %v1507_v59 }
 0x33c   : > { %1797 = vmatmul.mubr.bf16.vlgmr.msra.gmra.mxu0 %v1504_v60  ;;  %1837 = vmatmul.mubr.bf16.vlgmr.msra.gmra.mxu1 %v1506_v61 }
 0x33d   : > { %1848 = vmatpush1.bf16.msra.mxu0 %v3627_v11  ;;  %1889 = vmatpush1.bf16.msra.mxu1 %v3630_v12  ;;  %v2980_v12 = vld [vmem:[#allocation8 + $0x378] sm:$0xff]  }
 0x33e   : > { %1849 = vmatprep.subr.bf16.mxu0 %v3633_v13  ;;  %1890 = vmatprep.subr.bf16.mxu1 %v3636_v14  ;;  %v2981_v13 = vld [vmem:[#allocation8 + $0x3f8] sm:$0xff]  }
 0x33f   : > { %1879 = vmatprep.mubr.bf16.mxu0 %v3238_v0  ;;  %1920 = vmatprep.mubr.bf16.mxu1 %v3238_v0  ;;  %v1845_v0 = vld [vmem:[%s3452_s16 + $0x18] sm:$0xff] }
 0x340   : > { %v1846_v11 = vpack.c.bf16 %v1845_v0, %v1845_v0  ;;  %v2982_v14 = vld [vmem:[#allocation8 + $0x338] sm:$0xff]  }
 0x341   : > { %1850 = vmatpush1.bf16.msra.mxu0 %v3641_v15  ;;  %1891 = vmatpush1.bf16.msra.mxu1 %v3644_v16  ;;  %v2983_v15 = vld [vmem:[#allocation8 + $0x3b8] sm:$0xff]   ;;  %v2984_v16 = vld [vmem:[#allocation8 + $0x370] sm:$0xff]  }
 0x342   : > { %1851 = vmatprep.subr.bf16.mxu0 %v3647_v17  ;;  %1892 = vmatprep.subr.bf16.mxu1 %v3650_v18  ;;  %v2985_v17 = vld [vmem:[#allocation8 + $0x3f0] sm:$0xff]  }
 0x343   : > { %v2986_v18 = vld [vmem:[#allocation8 + $0x330] sm:$0xff]  }
 0x345   : > { %1852 = vmatpush1.bf16.msra.mxu0 %v3653_v19  ;;  %1893 = vmatpush1.bf16.msra.mxu1 %v3656_v20  ;;  %v2987_v19 = vld [vmem:[#allocation8 + $0x3b0] sm:$0xff]   ;;  %v2988_v20 = vld [vmem:[#allocation8 + $0x368] sm:$0xff]  }
 0x346   : > { %1853 = vmatprep.subr.bf16.mxu0 %v3659_v21  ;;  %1894 = vmatprep.subr.bf16.mxu1 %v3662_v22  ;;  %v2989_v21 = vld [vmem:[#allocation8 + $0x3e8] sm:$0xff]  }
 0x347   : > { %v2990_v22 = vld [vmem:[#allocation8 + $0x328] sm:$0xff]  }
 0x349   : > { %1854 = vmatpush1.bf16.msra.mxu0 %v3665_v23  ;;  %1895 = vmatpush1.bf16.msra.mxu1 %v3668_v24  ;;  %v2991_v23 = vld [vmem:[#allocation8 + $0x3a8] sm:$0xff]   ;;  %v2992_v24 = vld [vmem:[#allocation8 + $0x360] sm:$0xff]  }
 0x34a   : > { %1855 = vmatprep.subr.bf16.mxu0 %v3671_v25  ;;  %1896 = vmatprep.subr.bf16.mxu1 %v3674_v26  ;;  %v2993_v25 = vld [vmem:[#allocation8 + $0x3e0] sm:$0xff]  }
 0x34b   : > { %v2994_v26 = vld [vmem:[#allocation8 + $0x320] sm:$0xff]  }
 0x34d   : > { %1856 = vmatpush1.bf16.msra.mxu0 %v3677_v27  ;;  %1897 = vmatpush1.bf16.msra.mxu1 %v3680_v28  ;;  %v2995_v27 = vld [vmem:[#allocation8 + $0x3a0] sm:$0xff]   ;;  %v2996_v28 = vld [vmem:[#allocation8 + $0x358] sm:$0xff]  }
 0x34e   : > { %1857 = vmatprep.subr.bf16.mxu0 %v3683_v29  ;;  %1898 = vmatprep.subr.bf16.mxu1 %v3686_v30  ;;  %v2997_v29 = vld [vmem:[#allocation8 + $0x3d8] sm:$0xff]  }
 0x34f   : > { %v2998_v30 = vld [vmem:[#allocation8 + $0x318] sm:$0xff]  }
 0x351   : > { %1858 = vmatpush1.bf16.msra.mxu0 %v3689_v31  ;;  %1899 = vmatpush1.bf16.msra.mxu1 %v3692_v32  ;;  %v2999_v31 = vld [vmem:[#allocation8 + $0x398] sm:$0xff]   ;;  %v3000_v32 = vld [vmem:[#allocation8 + $0x350] sm:$0xff]  }
 0x352   : > { %1859 = vmatprep.subr.bf16.mxu0 %v3695_v34  ;;  %1900 = vmatprep.subr.bf16.mxu1 %v3698_v35  ;;  %v3001_v34 = vld [vmem:[#allocation8 + $0x3d0] sm:$0xff]  }
 0x353   : > { %v3002_v35 = vld [vmem:[#allocation8 + $0x310] sm:$0xff]  }
 0x355   : > { %1860 = vmatpush1.bf16.msra.mxu0 %v3701_v36  ;;  %1901 = vmatpush1.bf16.msra.mxu1 %v3704_v37  ;;  %v3003_v36 = vld [vmem:[#allocation8 + $0x390] sm:$0xff]   ;;  %v3004_v37 = vld [vmem:[#allocation8 + $0x348] sm:$0xff]  }
 0x356   : > { %1861 = vmatprep.subr.bf16.mxu0 %v3708_v41  ;;  %1902 = vmatprep.subr.bf16.mxu1 %v3711_v42  ;;  %v3005_v41 = vld [vmem:[#allocation8 + $0x3c8] sm:$0xff]  }
 0x357   : > { %v3006_v42 = vld [vmem:[#allocation8 + $0x308] sm:$0xff]  }
 0x359   : > { %1862 = vmatpush1.bf16.msra.mxu0 %v3714_v2  ;;  %1903 = vmatpush1.bf16.msra.mxu1 %v3717_v47  ;;  %v3007_v2 = vld [vmem:[#allocation8 + $0x388] sm:$0xff]   ;;  %v3008_v47 = vld [vmem:[#allocation8 + $0x340] sm:$0xff]  }
 0x35a   : > { %2715 = vmatprep.subr.bf16.mxu0 %v2980_v12  ;;  %2737 = vmatprep.subr.bf16.mxu1 %v2981_v13 }
 0x35c   : > { %1880 = vmatmul.mubr.bf16.vlgmr.msra.gmra.mxu0 %v1846_v11  ;;  %1921 = vmatmul.mubr.bf16.vlgmr.msra.gmra.mxu1 %v1846_v11 }
 0x35d   : > { %2716 = vmatpush3.bf16.msra.mxu0 %v2982_v14  ;;  %2738 = vmatpush3.bf16.msra.mxu1 %v2983_v15 }
 0x35e   : > { %2717 = vmatprep.subr.bf16.mxu0 %v2984_v16  ;;  %2739 = vmatprep.subr.bf16.mxu1 %v2985_v17 }
 0x361   : > { %2718 = vmatpush3.bf16.msra.mxu0 %v2986_v18  ;;  %2740 = vmatpush3.bf16.msra.mxu1 %v2987_v19 }
 0x362   : > { %2719 = vmatprep.subr.bf16.mxu0 %v2988_v20  ;;  %2741 = vmatprep.subr.bf16.mxu1 %v2989_v21 }
 0x365   : > { %2720 = vmatpush3.bf16.msra.mxu0 %v2990_v22  ;;  %2742 = vmatpush3.bf16.msra.mxu1 %v2991_v23 }
 0x366   : > { %2721 = vmatprep.subr.bf16.mxu0 %v2992_v24  ;;  %2743 = vmatprep.subr.bf16.mxu1 %v2993_v25 }
 0x369   : > { %2722 = vmatpush3.bf16.msra.mxu0 %v2994_v26  ;;  %2744 = vmatpush3.bf16.msra.mxu1 %v2995_v27 }
 0x36a   : > { %2723 = vmatprep.subr.bf16.mxu0 %v2996_v28  ;;  %2745 = vmatprep.subr.bf16.mxu1 %v2997_v29 }
 0x36d   : > { %2724 = vmatpush3.bf16.msra.mxu0 %v2998_v30  ;;  %2746 = vmatpush3.bf16.msra.mxu1 %v2999_v31 }
 0x36e   : > { %2725 = vmatprep.subr.bf16.mxu0 %v3000_v32  ;;  %2747 = vmatprep.subr.bf16.mxu1 %v3001_v34 }
 0x371   : > { %2726 = vmatpush3.bf16.msra.mxu0 %v3002_v35  ;;  %2748 = vmatpush3.bf16.msra.mxu1 %v3003_v36 }
 0x372   : > { %2727 = vmatprep.subr.bf16.mxu0 %v3004_v37  ;;  %2749 = vmatprep.subr.bf16.mxu1 %v3005_v41 }
 0x375   : > { %2728 = vmatpush3.bf16.msra.mxu0 %v3006_v42  ;;  %2750 = vmatpush3.bf16.msra.mxu1 %v3007_v2 }
 0x376   : > { %2729 = vmatprep.subr.bf16.mxu0 %v3008_v47  ;;  %2751 = vmatprep.subr.bf16.mxu1 %v3009_v62 }
 0x379   : > { %2730 = vmatpush3.bf16.msra.mxu0 %v3010_v63  ;;  %2752 = vmatpush3.bf16.msra.mxu1 %v3011_v33 }
 0x3fc   : > { %v2687_v3 = vpop.f32.mrf.mxu0  ;;  %v2709_v4 = vpop.f32.mrf.mxu1 }
 0x3fe   : > { %v2688_v5 = vpop.f32.mrf.mxu0  ;;  %v2710_v38 = vpop.f32.mrf.mxu1 }
 0x3ff   : > { %v2689_v6 = vadd.f32 %v2688_v5, %v2687_v3  ;;  %v2711_v7 = vadd.f32 %v2710_v38, %v2709_v4 }
 0x400   : > { %v2690_v8 = vpop.f32.mrf.mxu0  ;;  %v2712_v9 = vpop.f32.mrf.mxu1 }
 0x401   : > { %v1839_v10 = vadd.f32 %v2711_v7, %v2689_v6 }
 0x402   : > { %v2691_v40 = vpop.f32.mrf.mxu0  ;;  %v2713_v1 = vpop.f32.mrf.mxu1 }
 0x403   : > { %v1844_v48 = vadd.f32 %v1839_v10, %v3727_v39 }
 0x41c   : > { %v1881_v49 = vpop.f32.mrf.mxu0  ;;  %v1922_v51 = vpop.f32.mrf.mxu1 }
 0x41d   : > { %v1882_v52 = vadd.f32 %v1881_v49, %v3570_v43  ;;  %v1923_v50 = vadd.f32 %v1922_v51, %v3572_v44 }
 0x41e   : > { %v1883_v53 = vpop.f32.mrf.mxu0  ;;  %v1924_v54 = vpop.f32.mrf.mxu1 }
 0x41f   : > { %v1884_v55 = vadd.f32 %v1883_v53, %v3574_v45  ;;  %v1925_v56 = vadd.f32 %v1924_v54, %v3576_v46  ;;  %v1929_v57 = vmax.f32 %v1882_v52, 0.0  ;;  %v1931_v58 = vmax.f32 %v1923_v50, 0.0 }
 0x420   : > { %v1885_v59 = vpop.f32.mrf.mxu0  ;;  %v1926_v60 = vpop.f32.mrf.mxu1 }
 0x421   : > { %v1930_v61 = vmax.f32 %v1884_v55, 0.0  ;;  %v1932_v0 = vmax.f32 %v1925_v56, 0.0  ;;  %v1933_v43 = vpack.c.bf16 %v1929_v57, %v1929_v57  ;;  %v1935_v44 = vpack.c.bf16 %v1931_v58, %v1931_v58 }
 0x422   : > { %v1886_v11 = vpop.f32.mrf.mxu0  ;;  %v1927_v39 = vpop.f32.mrf.mxu1 }
 0x423   : > { %v1934_v12 = vpack.c.bf16 %v1930_v61, %v1930_v61  ;;  %v1936_v13 = vpack.c.bf16 %v1932_v0, %v1932_v0 }
 0x425   : > { %2225 = vmatprep.mubr.bf16.mxu0 %v1934_v12  ;;  %2265 = vmatprep.mubr.bf16.mxu1 %v1936_v13 }
 0x426   : > { %2226 = vmatmul.mubr.bf16.vlgmr.msra.gmra.mxu0 %v1933_v43  ;;  %2266 = vmatmul.mubr.bf16.vlgmr.msra.gmra.mxu1 %v1935_v44 }
 0x4e6   : > { %v2731_v45 = vpop.f32.mrf.mxu0  ;;  %v2753_v46 = vpop.f32.mrf.mxu1 }
 0x4e8   : > { %v2732_v14 = vpop.f32.mrf.mxu0  ;;  %v2754_v15 = vpop.f32.mrf.mxu1 }
 0x4e9   : > { %v2733_v16 = vadd.f32 %v2732_v14, %v2731_v45  ;;  %v2755_v17 = vadd.f32 %v2754_v15, %v2753_v46 }
 0x4ea   : > { %v2734_v18 = vpop.f32.mrf.mxu0  ;;  %v2756_v19 = vpop.f32.mrf.mxu1 }
 0x4eb   : > { %v2268_v20 = vadd.f32 %v2755_v17, %v2733_v16 }
 0x4ec   : > { %v2735_v21 = vpop.f32.mrf.mxu0  ;;  %v2757_v22 = vpop.f32.mrf.mxu1 }
 0x4ed   : > { %v2273_v23 = vadd.f32 %v2268_v20, %v1844_v48 }
 0x4ef   : > { %2274 = vst [vmem:[%s333_s13] sm:$0xff] %v2273_v23 }
 0x4f0   : > { %3165 = shalt.err (!%p3162_p7)
}
 0x4f1   : > { %s3166_s18 = scalar_lea.hbm %s2287_s15, 128  ;;  %s3170_s27 = scalar_lea.hbm %s3813_s6, 512 }
 0x4f2   : > { %p3167_p0 = scmp.ne.s32.totalorder %s2287_s15, %s3166_s18  ;;  %p3171_p13 = scmp.lt.s32.totalorder %s2287_s15, %s3813_s6 }
 0x4f3   : > { %p3172_p2 = scmp.lt.s32.totalorder %s3170_s27, %s3166_s18 }
 0x4f4   : > { %p3168_p8 = pnand %p3167_p0, %p3837_p5 }
 0x4f5   : > { %p3173_p6 = por %p3172_p2, %p3171_p13 }
 0x4f6   : > { %p3169_p10 = pneg %p3168_p8 }
 0x4f8   : > { %p3174_p11 = pnand %p3173_p6, %p3169_p10 }
 0x4fa   : > { %3177 = shalt.err (!%p3174_p11)
}
 0x4fb   : > { %2771 = dma.vmem_to_hbm [thread:$0]  (%p3837_p5), %s2290_s14, 128, %s2287_s15, %s2276_s17  }
 0x4fc PF: > { %p2796_p9 = scmp.ge.s32.totalorder %s3228_s24, 2  ;;  %s2301_s7 = sand.u32 1, %s3216_s21  }
 0x4fd   : > { %p3838_p12 = scmp.ne.s32.totalorder %s3821_s28, 0  ;;  %s2302_s8 = scalar_lea.sflag [#allocation4], %s2301_s7 }
 0x4ff   : > { %p2788_p3 = pnand %p2796_p9, %p3838_p12 }
 0x501   : > { %p2789_p1 = pneg %p2788_p3 }
 0x503   : > { %3211 = dma.done.wait (%p2789_p1), %s2302_s8, 128  }
 0x504   : > { %3213 = vsyncadd (%p2789_p1), %s2302_s8, 4294967168  ;;  %p23_p4 = scmp.ge.s32.totalorder %s3346_s26, 6   ;;  %s3839_s21 = smov %s3220_s22 }
 0x505   : > { %s3840_s22 = smov %s3224_s23  ;;  %s3841_s23 = smov %s3355_s9 }
 0x506   : > { %s3842_s24 = smov %s3346_s26  ;;  %25 = sbr.rel (!%p23_p4) target bundleno = 11 (0xb), region = 110 }
 0x50b   :  { %2307 = vsyncpa [#allocation3], 1 }
 0x50c   :  { %2309 = vsyncpa [#allocation3 + $0x1], 1 }
 0x50d   :  { %2310 = vsyncpa [#allocation6], 1 }
 0x50e   :  { %2312 = vsyncpa [#allocation6 + $0x1], 1 }
 0x50f   :  { %2313 = vsyncpa [#allocation9], 1 }
 0x510   :  { %2314 = vsyncpa [#allocation4], 1 }
 0x511   :  { %2316 = vsyncpa [#allocation4 + $0x1], 1 }

</bundles_post_ra>
